<compile_context>
chip_gen: v7x
topology: tpu7x:2x2x1
jax: 0.10.0
libtpu: 0.0.40
codegen_flags: <defaults>
</compile_context>

<pallas_src>
import functools
import math

import jax
import jax.numpy as jnp
from jax.experimental import pallas as pl
from jax.experimental.pallas import tpu as pltpu

LN_EPS = 1e-5


def _layernorm(x, gamma, beta):
    mu = jnp.mean(x, axis=-1, keepdims=True)
    var = jnp.mean((x - mu) ** 2, axis=-1, keepdims=True)
    return (x - mu) * jax.lax.rsqrt(var + LN_EPS) * gamma + beta


def encoder_kernel(x_ref, wqkv_ref, bqkv_ref, wo_ref, bo_ref,
                   w1_ref, b1_ref, w2_ref, b2_ref,
                   g1_ref, be1_ref, g2_ref, be2_ref,
                   o_ref, *, num_heads, batch_tile, seq_len, ff_chunk):
    BT, S, H = batch_tile, seq_len, num_heads
    E = x_ref.shape[-1]
    Dh = E // H
    rows = BT * S
    scale = 1.0 / math.sqrt(Dh)

    # Fold the batch tile into the matmul M dimension: (BT, S, E) -> (BT*S, E).
    x = x_ref[...].reshape(rows, E)                       # f32

    # ---- Fused QKV projection: bf16 operands, f32 accumulation --------------------
    qkv = jnp.dot(x.astype(jnp.bfloat16), wqkv_ref[...],
                  preferred_element_type=jnp.float32) + bqkv_ref[...]   # (rows, 3E) f32
    q = (qkv[:, :E] * scale).astype(jnp.bfloat16)         # fold 1/sqrt(Dh) into q
    k = qkv[:, E:2 * E].astype(jnp.bfloat16)
    v = qkv[:, 2 * E:].astype(jnp.bfloat16)

    # ---- Multi-head attention, batched over (H * BT) ------------------------------
    def split_heads(t):  # (rows, E) -> (H*BT, S, Dh): lane slices + major-axis concat
        return jnp.concatenate(
            [t[:, h * Dh:(h + 1) * Dh].reshape(BT, S, Dh) for h in range(H)], axis=0)

    q3, k3, v3 = split_heads(q), split_heads(k), split_heads(v)

    s = jnp.einsum('bqd,bkd->bqk', q3, k3,
                   preferred_element_type=jnp.float32)     # (H*BT, S, S) f32
    s = s - jnp.max(s, axis=-1, keepdims=True)
    p = jnp.exp(s)
    # EUP reciprocal (separate issue slot); ~1e-3 rel. error vs exact divide.
    p = p * pl.reciprocal(jnp.sum(p, axis=-1, keepdims=True), approx=True)
    ctx = jnp.einsum('bqk,bkd->bqd', p.astype(jnp.bfloat16), v3,
                     preferred_element_type=jnp.float32)   # (H*BT, S, Dh) f32

    # Merge heads back to a lane-dense (rows, E) slab once (single concat; no masked
    # 32-lane stores and no attention scratch buffer).
    ctx4 = ctx.astype(jnp.bfloat16).reshape(H, BT, S, Dh)
    attn = jnp.concatenate([ctx4[h] for h in range(H)], axis=-1).reshape(rows, E)

    # ---- Output projection + residual + LayerNorm ----------------------------------
    out1 = jnp.dot(attn, wo_ref[...],
                   preferred_element_type=jnp.float32) + bo_ref[...]
    # dropout -> identity (eval mode)
    y1 = _layernorm(x + out1, g1_ref[...], be1_ref[...])

    # ---- Feed-forward: Linear -> ReLU -> Linear, tiled over the FF inner dim --------
    FF = w1_ref.shape[1]
    y1b = y1.astype(jnp.bfloat16)
    out2 = jnp.zeros((rows, E), jnp.float32)
    for c0 in range(0, FF, ff_chunk):                      # static, few iterations
        c1 = min(FF, c0 + ff_chunk)
        hck = jnp.dot(y1b, w1_ref[:, c0:c1],
                      preferred_element_type=jnp.float32) + b1_ref[:, c0:c1]
        hck = jnp.maximum(hck, 0.0).astype(jnp.bfloat16)
        out2 = out2 + jnp.dot(hck, w2_ref[c0:c1, :],
                              preferred_element_type=jnp.float32)
    out2 = out2 + b2_ref[...]
    # dropout -> identity (eval mode)
    y2 = _layernorm(y1 + out2, g2_ref[...], be2_ref[...])

    o_ref[...] = y2.reshape(BT, S, E).astype(o_ref.dtype)


def _pick_batch_tile(B, S, target_rows=256):
    """Fold batch rows into M, targeting ~256 MXU rows. Never forces extra grid steps
    (single-TC v5e/v6e would only pay serialization for them)."""
    bt = max(1, min(B, max(1, target_rows // max(S, 1))))
    while B % bt:
        bt -= 1
    return bt


def _vmem_limit_bytes(BT, S, E, FF, ff_chunk, num_heads):
    """Generous scoped-VMEM estimate for the tile + resident weights (+ headroom)."""
    rows = BT * S
    f32, bf16 = 4, 2
    nb = num_heads * BT
    io = 2 * (2 * rows * E * f32)                              # x in + out (2 buffers)
    weights = 2 * bf16 * (3 * E * E + E * E + 2 * E * FF)      # bf16 weights (2 buffers)
    vecs = 2 * f32 * (3 * E + E + FF + E + 4 * E)              # biases + LN params
    work = (rows * 3 * E * (f32 + bf16)                        # qkv + bf16 q/k/v
            + nb * S * S * (f32 + bf16)                        # scores + probs
            + rows * E * (3 * f32 + 2 * bf16)                  # ctx/attn/y1/out2/y2
            + rows * min(FF, ff_chunk) * (f32 + bf16))         # ff chunk
    est = int(1.5 * (io + weights + vecs + work)) + (4 << 20)
    return max(32 << 20, min(est, 64 << 20))


def transformer_encoder(x, params, *, num_heads, batch_tile=None, ff_chunk=None,
                        out_dtype=None):
    B, S, E = x.shape
    FF = params["w1"].shape[1]
    BT = batch_tile if batch_tile is not None else _pick_batch_tile(B, S)
    assert B % BT == 0, "batch_tile must divide batch"
    FC = ff_chunk if ff_chunk is not None else max(128, min(FF, 1024))
    out_dtype = x.dtype if out_dtype is None else out_dtype
    H, Dh = num_heads, E // num_heads

    grid = (B // BT,)

    def full(shape):
        # Constant block index across the grid -> Pallas does not re-DMA this block
        # between steps, so weights/params stay VMEM-resident for the whole call.
        return pl.BlockSpec(shape, lambda b, _shape=shape: tuple(0 for _ in _shape))

    grid_spec = pltpu.PrefetchScalarGridSpec(
        num_scalar_prefetch=0,
        grid=grid,
        in_specs=[
            pl.BlockSpec((BT, S, E), lambda b: (b, 0, 0)),   # x
            full((E, 3 * E)),                                # wqkv (bf16)
            full((1, 3 * E)),                                # bqkv
            full((E, E)),                                    # wo (bf16)
            full((1, E)),                                    # bo
            full((E, FF)),                                   # w1 (bf16)
            full((1, FF)),                                   # b1
            full((FF, E)),                                   # w2 (bf16)
            full((1, E)),                                    # b2
            full((1, E)), full((1, E)),                      # gamma1, beta1
            full((1, E)), full((1, E)),                      # gamma2, beta2
        ],
        out_specs=pl.BlockSpec((BT, S, E), lambda b: (b, 0, 0)),
    )

    flops = (2 * B * S * E * 3 * E            # qkv projection
             + 2 * B * H * S * S * Dh * 2     # scores + p@v
             + 2 * B * S * E * E              # output projection
             + 2 * B * S * E * FF * 2)        # feed-forward
    transcendentals = B * H * S * S + 4 * B * S
    bytes_accessed = (2 * (3 * E * E + E * E + 2 * E * FF)      # bf16 weights
                      + 4 * (3 * E + E + FF + E + 4 * E)        # f32 biases / LN params
                      + 4 * B * S * E * 2)                      # x in + out
    cost = pl.CostEstimate(flops=flops, transcendentals=transcendentals,
                           bytes_accessed=bytes_accessed)

    fn = pl.pallas_call(
        functools.partial(encoder_kernel, num_heads=num_heads, batch_tile=BT,
                          seq_len=S, ff_chunk=FC),
        out_shape=jax.ShapeDtypeStruct((B, S, E), out_dtype),
        grid_spec=grid_spec,
        compiler_params=pltpu.CompilerParams(
            dimension_semantics=("parallel",),
            vmem_limit_bytes=_vmem_limit_bytes(BT, S, E, FF, FC, num_heads)),
        cost_estimate=cost,
    )

    return fn(
        x,
        params["wqkv"].astype(jnp.bfloat16), params["bqkv"],
        params["wo"].astype(jnp.bfloat16),   params["bo"],
        params["w1"].astype(jnp.bfloat16),   params["b1"],
        params["w2"].astype(jnp.bfloat16),   params["b2"],
        params["g1"], params["be1"], params["g2"], params["be2"],
    )


def reference_encoder(x, params, *, num_heads):
    """Pure-JAX f32 reference mirroring torch semantics (eval mode, mask=None)."""
    B, S, E = x.shape
    Dh = E // num_heads
    qkv = x @ params["wqkv"] + params["bqkv"]
    q, k, v = qkv[..., :E], qkv[..., E:2 * E], qkv[..., 2 * E:]

    def split_heads(t):  # (B, S, E) -> (B, H, S, Dh)
        return t.reshape(B, S, num_heads, Dh).transpose(0, 2, 1, 3)

    qh, kh, vh = split_heads(q), split_heads(k), split_heads(v)
    scores = jnp.einsum("bhsd,bhtd->bhst", qh, kh) / (Dh ** 0.5)
    p = jax.nn.softmax(scores, axis=-1)
    attn = jnp.einsum("bhst,bhtd->bhsd", p, vh).transpose(0, 2, 1, 3).reshape(B, S, E)
    out1 = attn @ params["wo"] + params["bo"]

    def ln(t, g, b):
        mu = t.mean(-1, keepdims=True)
        var = ((t - mu) ** 2).mean(-1, keepdims=True)
        return (t - mu) / jnp.sqrt(var + LN_EPS) * g + b

    y1 = ln(x + out1, params["g1"], params["be1"])
    h1 = jnp.maximum(y1 @ params["w1"] + params["b1"], 0.0)
    out2 = h1 @ params["w2"] + params["b2"]
    return ln(y1 + out2, params["g2"], params["be2"])


def init_params(key, embed_dim, ff_dim):
    ks = jax.random.split(key, 6)
    scale = 0.05
    return {
        "wqkv": scale * jax.random.normal(ks[0], (embed_dim, 3 * embed_dim), jnp.float32),
        "bqkv": jnp.zeros((1, 3 * embed_dim), jnp.float32),
        "wo":   scale * jax.random.normal(ks[1], (embed_dim, embed_dim), jnp.float32),
        "bo":   0.01 * jnp.ones((1, embed_dim), jnp.float32),
        "w1":   scale * jax.random.normal(ks[2], (embed_dim, ff_dim), jnp.float32),
        "b1":   0.01 * jnp.ones((1, ff_dim), jnp.float32),
        "w2":   scale * jax.random.normal(ks[3], (ff_dim, embed_dim), jnp.float32),
        "b2":   0.01 * jnp.ones((1, embed_dim), jnp.float32),
        "g1":   1.0 + 0.1 * jax.random.normal(ks[4], (1, embed_dim), jnp.float32),
        "be1":  jnp.zeros((1, embed_dim), jnp.float32),
        "g2":   1.0 + 0.1 * jax.random.normal(ks[5], (1, embed_dim), jnp.float32),
        "be2":  jnp.zeros((1, embed_dim), jnp.float32),
    }


if __name__ == "__main__":
    B, S = 2, 8
    EMBED_DIM, NUM_HEADS = 128, 4
    FEED_FORWARD_INNER_DIM = 2048

    root = jax.random.PRNGKey(0)
    kx, kp = jax.random.split(root)
    x = jax.random.normal(kx, (B, S, EMBED_DIM), jnp.float32)
    params = init_params(kp, EMBED_DIM, FEED_FORWARD_INNER_DIM)

    out = transformer_encoder(x, params, num_heads=NUM_HEADS)
    out = jax.block_until_ready(out)

    ref = reference_encoder(x, params, num_heads=NUM_HEADS)
    assert out.shape == (B, S, EMBED_DIM)
    # bf16 matmul operands + approximate EUP reciprocal vs f32 reference.
    assert jnp.allclose(out, ref, rtol=5e-2, atol=5e-2), "kernel/reference mismatch"

    print("KERNEL_OK")
</pallas_src>

<mosaic_0001>
module attributes {stable_mosaic.version = 11 : i64} {
  func.func @encoder_kernel(%arg0: i32, %arg1: memref<2x8x128xf32, #tpu.memory_space<vmem>>, %arg2: memref<128x384xbf16, #tpu.memory_space<vmem>>, %arg3: memref<1x384xf32, #tpu.memory_space<vmem>>, %arg4: memref<128x128xbf16, #tpu.memory_space<vmem>>, %arg5: memref<1x128xf32, #tpu.memory_space<vmem>>, %arg6: memref<128x2048xbf16, #tpu.memory_space<vmem>>, %arg7: memref<1x2048xf32, #tpu.memory_space<vmem>>, %arg8: memref<2048x128xbf16, #tpu.memory_space<vmem>>, %arg9: memref<1x128xf32, #tpu.memory_space<vmem>>, %arg10: memref<1x128xf32, #tpu.memory_space<vmem>>, %arg11: memref<1x128xf32, #tpu.memory_space<vmem>>, %arg12: memref<1x128xf32, #tpu.memory_space<vmem>>, %arg13: memref<1x128xf32, #tpu.memory_space<vmem>>, %arg14: memref<2x8x128xf32, #tpu.memory_space<vmem>>) attributes {dimension_semantics = [#tpu.dimension_semantics<parallel>], iteration_bounds = array<i64: 1>, scalar_prefetch = 0 : i64, scratch_operands = 0 : i64, tpu.core_type = #tpu.core_type<tc>, window_params = [{transform_indices = @transform_0, window_bounds = array<i64: 2, 8, 128>}, {pipeline_mode = #tpu.pipeline_mode<synchronous>, transform_indices = @transform_1, window_bounds = array<i64: 128, 384>}, {pipeline_mode = #tpu.pipeline_mode<synchronous>, transform_indices = @transform_2, window_bounds = array<i64: 1, 384>}, {pipeline_mode = #tpu.pipeline_mode<synchronous>, transform_indices = @transform_3, window_bounds = array<i64: 128, 128>}, {pipeline_mode = #tpu.pipeline_mode<synchronous>, transform_indices = @transform_4, window_bounds = array<i64: 1, 128>}, {pipeline_mode = #tpu.pipeline_mode<synchronous>, transform_indices = @transform_5, window_bounds = array<i64: 128, 2048>}, {pipeline_mode = #tpu.pipeline_mode<synchronous>, transform_indices = @transform_6, window_bounds = array<i64: 1, 2048>}, {pipeline_mode = #tpu.pipeline_mode<synchronous>, transform_indices = @transform_7, window_bounds = array<i64: 2048, 128>}, {pipeline_mode = #tpu.pipeline_mode<synchronous>, transform_indices = @transform_8, window_bounds = array<i64: 1, 128>}, {pipeline_mode = #tpu.pipeline_mode<synchronous>, transform_indices = @transform_9, window_bounds = array<i64: 1, 128>}, {pipeline_mode = #tpu.pipeline_mode<synchronous>, transform_indices = @transform_10, window_bounds = array<i64: 1, 128>}, {pipeline_mode = #tpu.pipeline_mode<synchronous>, transform_indices = @transform_11, window_bounds = array<i64: 1, 128>}, {pipeline_mode = #tpu.pipeline_mode<synchronous>, transform_indices = @transform_12, window_bounds = array<i64: 1, 128>}, {transform_indices = @transform_13, window_bounds = array<i64: 2, 8, 128>}]} {
    %c0 = arith.constant 0 : index
    %c0_0 = arith.constant 0 : index
    %c0_1 = arith.constant 0 : index
    %0 = vector.load %arg1[%c0, %c0_0, %c0_1] : memref<2x8x128xf32, #tpu.memory_space<vmem>>, vector<2x8x128xf32>
    %1 = vector.shape_cast %0 : vector<2x8x128xf32> to vector<16x128xf32>
    %2 = arith.truncf %1 : vector<16x128xf32> to vector<16x128xbf16>
    %c0_2 = arith.constant 0 : index
    %c0_3 = arith.constant 0 : index
    %3 = vector.load %arg2[%c0_2, %c0_3] : memref<128x384xbf16, #tpu.memory_space<vmem>>, vector<128x384xbf16>
    %cst = arith.constant dense<0.000000e+00> : vector<16x384xf32>
    %4 = tpu.matmul %2, %3, %cst {dimension_numbers = #tpu.dot_dimension_numbers<[1], [0], [0], [1], [0, 0, 1, 1], [], []>} : vector<16x128xbf16>, vector<128x384xbf16>, vector<16x384xf32> -> vector<16x384xf32>
    %c0_4 = arith.constant 0 : index
    %c0_5 = arith.constant 0 : index
    %5 = vector.load %arg3[%c0_4, %c0_5] : memref<1x384xf32, #tpu.memory_space<vmem>>, vector<1x384xf32>
    %6 = vector.broadcast %5 : vector<1x384xf32> to vector<16x384xf32>
    %7 = arith.addf %4, %6 : vector<16x384xf32>
    %8 = vector.extract_strided_slice %7 {offsets = [0, 0], sizes = [16, 128], strides = [1, 1]} : vector<16x384xf32> to vector<16x128xf32>
    %cst_6 = arith.constant 0.176776692 : f32
    %9 = vector.broadcast %cst_6 : f32 to vector<16x128xf32>
    %10 = arith.mulf %8, %9 : vector<16x128xf32>
    %11 = arith.truncf %10 : vector<16x128xf32> to vector<16x128xbf16>
    %12 = vector.extract_strided_slice %7 {offsets = [0, 128], sizes = [16, 128], strides = [1, 1]} : vector<16x384xf32> to vector<16x128xf32>
    %13 = arith.truncf %12 : vector<16x128xf32> to vector<16x128xbf16>
    %14 = vector.extract_strided_slice %7 {offsets = [0, 256], sizes = [16, 128], strides = [1, 1]} : vector<16x384xf32> to vector<16x128xf32>
    %15 = arith.truncf %14 : vector<16x128xf32> to vector<16x128xbf16>
    %16 = vector.extract_strided_slice %11 {offsets = [0, 0], sizes = [16, 32], strides = [1, 1]} : vector<16x128xbf16> to vector<16x32xbf16>
    %17 = vector.shape_cast %16 : vector<16x32xbf16> to vector<2x8x32xbf16>
    %18 = vector.extract_strided_slice %11 {offsets = [0, 32], sizes = [16, 32], strides = [1, 1]} : vector<16x128xbf16> to vector<16x32xbf16>
    %19 = vector.shape_cast %18 : vector<16x32xbf16> to vector<2x8x32xbf16>
    %20 = vector.extract_strided_slice %11 {offsets = [0, 64], sizes = [16, 32], strides = [1, 1]} : vector<16x128xbf16> to vector<16x32xbf16>
    %21 = vector.shape_cast %20 : vector<16x32xbf16> to vector<2x8x32xbf16>
    %22 = vector.extract_strided_slice %11 {offsets = [0, 96], sizes = [16, 32], strides = [1, 1]} : vector<16x128xbf16> to vector<16x32xbf16>
    %23 = vector.shape_cast %22 : vector<16x32xbf16> to vector<2x8x32xbf16>
    %24 = tpu.concatenate %17, %19, %21, %23 in 0 : vector<2x8x32xbf16>, vector<2x8x32xbf16>, vector<2x8x32xbf16>, vector<2x8x32xbf16> -> vector<8x8x32xbf16>
    %25 = vector.extract_strided_slice %13 {offsets = [0, 0], sizes = [16, 32], strides = [1, 1]} : vector<16x128xbf16> to vector<16x32xbf16>
    %26 = vector.shape_cast %25 : vector<16x32xbf16> to vector<2x8x32xbf16>
    %27 = vector.extract_strided_slice %13 {offsets = [0, 32], sizes = [16, 32], strides = [1, 1]} : vector<16x128xbf16> to vector<16x32xbf16>
    %28 = vector.shape_cast %27 : vector<16x32xbf16> to vector<2x8x32xbf16>
    %29 = vector.extract_strided_slice %13 {offsets = [0, 64], sizes = [16, 32], strides = [1, 1]} : vector<16x128xbf16> to vector<16x32xbf16>
    %30 = vector.shape_cast %29 : vector<16x32xbf16> to vector<2x8x32xbf16>
    %31 = vector.extract_strided_slice %13 {offsets = [0, 96], sizes = [16, 32], strides = [1, 1]} : vector<16x128xbf16> to vector<16x32xbf16>
    %32 = vector.shape_cast %31 : vector<16x32xbf16> to vector<2x8x32xbf16>
    %33 = tpu.concatenate %26, %28, %30, %32 in 0 : vector<2x8x32xbf16>, vector<2x8x32xbf16>, vector<2x8x32xbf16>, vector<2x8x32xbf16> -> vector<8x8x32xbf16>
    %34 = vector.extract_strided_slice %15 {offsets = [0, 0], sizes = [16, 32], strides = [1, 1]} : vector<16x128xbf16> to vector<16x32xbf16>
    %35 = vector.shape_cast %34 : vector<16x32xbf16> to vector<2x8x32xbf16>
    %36 = vector.extract_strided_slice %15 {offsets = [0, 32], sizes = [16, 32], strides = [1, 1]} : vector<16x128xbf16> to vector<16x32xbf16>
    %37 = vector.shape_cast %36 : vector<16x32xbf16> to vector<2x8x32xbf16>
    %38 = vector.extract_strided_slice %15 {offsets = [0, 64], sizes = [16, 32], strides = [1, 1]} : vector<16x128xbf16> to vector<16x32xbf16>
    %39 = vector.shape_cast %38 : vector<16x32xbf16> to vector<2x8x32xbf16>
    %40 = vector.extract_strided_slice %15 {offsets = [0, 96], sizes = [16, 32], strides = [1, 1]} : vector<16x128xbf16> to vector<16x32xbf16>
    %41 = vector.shape_cast %40 : vector<16x32xbf16> to vector<2x8x32xbf16>
    %42 = tpu.concatenate %35, %37, %39, %41 in 0 : vector<2x8x32xbf16>, vector<2x8x32xbf16>, vector<2x8x32xbf16>, vector<2x8x32xbf16> -> vector<8x8x32xbf16>
    "tpu.trace_start"() <{level = 10 : i32, message = "bqd,bkd->bqk"}> : () -> ()
    %cst_7 = arith.constant dense<0.000000e+00> : vector<8x8x8xf32>
    %43 = tpu.matmul %24, %33, %cst_7 {dimension_numbers = #tpu.dot_dimension_numbers<[2], [2], [1], [1], [0, 0, 0, 1, 1, 1], [0], [0]>} : vector<8x8x32xbf16>, vector<8x8x32xbf16>, vector<8x8x8xf32> -> vector<8x8x8xf32>
    "tpu.trace_stop"() : () -> ()
    %cst_8 = arith.constant dense<0xFF800000> : vector<8x8xf32>
    %44 = vector.multi_reduction <maximumf>, %43, %cst_8 [2] : vector<8x8x8xf32> to vector<8x8xf32>
    %45 = vector.shape_cast %44 : vector<8x8xf32> to vector<8x8x1xf32>
    %46 = vector.broadcast %45 : vector<8x8x1xf32> to vector<8x8x8xf32>
    %47 = arith.subf %43, %46 : vector<8x8x8xf32>
    %48 = math.exp %47 : vector<8x8x8xf32>
    %cst_9 = arith.constant dense<0.000000e+00> : vector<8x8xf32>
    %49 = vector.multi_reduction <add>, %48, %cst_9 [2] : vector<8x8x8xf32> to vector<8x8xf32>
    %50 = vector.shape_cast %49 : vector<8x8xf32> to vector<8x8x1xf32>
    %51 = tpu.reciprocal %50 {approx = true} : vector<8x8x1xf32> -> vector<8x8x1xf32>
    %52 = vector.broadcast %51 : vector<8x8x1xf32> to vector<8x8x8xf32>
    %53 = arith.mulf %48, %52 : vector<8x8x8xf32>
    %54 = arith.truncf %53 : vector<8x8x8xf32> to vector<8x8x8xbf16>
    "tpu.trace_start"() <{level = 10 : i32, message = "bqk,bkd->bqd"}> : () -> ()
    %cst_10 = arith.constant dense<0.000000e+00> : vector<8x8x32xf32>
    %55 = tpu.matmul %54, %42, %cst_10 {dimension_numbers = #tpu.dot_dimension_numbers<[2], [1], [1], [2], [0, 0, 0, 1, 1, 2], [0], [0]>} : vector<8x8x8xbf16>, vector<8x8x32xbf16>, vector<8x8x32xf32> -> vector<8x8x32xf32>
    "tpu.trace_stop"() : () -> ()
    %56 = arith.truncf %55 : vector<8x8x32xf32> to vector<8x8x32xbf16>
    %57 = vector.shape_cast %56 : vector<8x8x32xbf16> to vector<4x2x8x32xbf16>
    %58 = vector.extract_strided_slice %57 {offsets = [0, 0, 0, 0], sizes = [1, 2, 8, 32], strides = [1, 1, 1, 1]} : vector<4x2x8x32xbf16> to vector<1x2x8x32xbf16>
    %59 = vector.shape_cast %58 : vector<1x2x8x32xbf16> to vector<2x8x32xbf16>
    %60 = vector.extract_strided_slice %57 {offsets = [1, 0, 0, 0], sizes = [1, 2, 8, 32], strides = [1, 1, 1, 1]} : vector<4x2x8x32xbf16> to vector<1x2x8x32xbf16>
    %61 = vector.shape_cast %60 : vector<1x2x8x32xbf16> to vector<2x8x32xbf16>
    %62 = vector.extract_strided_slice %57 {offsets = [2, 0, 0, 0], sizes = [1, 2, 8, 32], strides = [1, 1, 1, 1]} : vector<4x2x8x32xbf16> to vector<1x2x8x32xbf16>
    %63 = vector.shape_cast %62 : vector<1x2x8x32xbf16> to vector<2x8x32xbf16>
    %64 = vector.extract_strided_slice %57 {offsets = [3, 0, 0, 0], sizes = [1, 2, 8, 32], strides = [1, 1, 1, 1]} : vector<4x2x8x32xbf16> to vector<1x2x8x32xbf16>
    %65 = vector.shape_cast %64 : vector<1x2x8x32xbf16> to vector<2x8x32xbf16>
    %66 = tpu.concatenate %59, %61, %63, %65 in 2 : vector<2x8x32xbf16>, vector<2x8x32xbf16>, vector<2x8x32xbf16>, vector<2x8x32xbf16> -> vector<2x8x128xbf16>
    %67 = vector.shape_cast %66 : vector<2x8x128xbf16> to vector<16x128xbf16>
    %c0_11 = arith.constant 0 : index
    %c0_12 = arith.constant 0 : index
    %68 = vector.load %arg4[%c0_11, %c0_12] : memref<128x128xbf16, #tpu.memory_space<vmem>>, vector<128x128xbf16>
    %cst_13 = arith.constant dense<0.000000e+00> : vector<16x128xf32>
    %69 = tpu.matmul %67, %68, %cst_13 {dimension_numbers = #tpu.dot_dimension_numbers<[1], [0], [0], [1], [0, 0, 1, 1], [], []>} : vector<16x128xbf16>, vector<128x128xbf16>, vector<16x128xf32> -> vector<16x128xf32>
    %c0_14 = arith.constant 0 : index
    %c0_15 = arith.constant 0 : index
    %70 = vector.load %arg5[%c0_14, %c0_15] : memref<1x128xf32, #tpu.memory_space<vmem>>, vector<1x128xf32>
    %71 = vector.broadcast %70 : vector<1x128xf32> to vector<16x128xf32>
    %72 = arith.addf %69, %71 : vector<16x128xf32>
    %73 = arith.addf %1, %72 : vector<16x128xf32>
    %c0_16 = arith.constant 0 : index
    %c0_17 = arith.constant 0 : index
    %74 = vector.load %arg10[%c0_16, %c0_17] : memref<1x128xf32, #tpu.memory_space<vmem>>, vector<1x128xf32>
    %c0_18 = arith.constant 0 : index
    %c0_19 = arith.constant 0 : index
    %75 = vector.load %arg11[%c0_18, %c0_19] : memref<1x128xf32, #tpu.memory_space<vmem>>, vector<1x128xf32>
    %cst_20 = arith.constant dense<0.000000e+00> : vector<16xf32>
    %76 = vector.multi_reduction <add>, %73, %cst_20 [1] : vector<16x128xf32> to vector<16xf32>
    %77 = vector.shape_cast %76 : vector<16xf32> to vector<16x1xf32>
    %cst_21 = arith.constant 1.280000e+02 : f32
    %78 = vector.broadcast %cst_21 : f32 to vector<16x1xf32>
    %79 = arith.divf %77, %78 : vector<16x1xf32>
    %80 = vector.broadcast %79 : vector<16x1xf32> to vector<16x128xf32>
    %81 = arith.subf %73, %80 : vector<16x128xf32>
    %82 = arith.mulf %81, %81 : vector<16x128xf32>
    %cst_22 = arith.constant dense<0.000000e+00> : vector<16xf32>
    %83 = vector.multi_reduction <add>, %82, %cst_22 [1] : vector<16x128xf32> to vector<16xf32>
    %84 = vector.shape_cast %83 : vector<16xf32> to vector<16x1xf32>
    %cst_23 = arith.constant 1.280000e+02 : f32
    %85 = vector.broadcast %cst_23 : f32 to vector<16x1xf32>
    %86 = arith.divf %84, %85 : vector<16x1xf32>
    %87 = vector.broadcast %79 : vector<16x1xf32> to vector<16x128xf32>
    %88 = arith.subf %73, %87 : vector<16x128xf32>
    %cst_24 = arith.constant 9.99999974E-6 : f32
    %89 = vector.broadcast %cst_24 : f32 to vector<16x1xf32>
    %90 = arith.addf %86, %89 : vector<16x1xf32>
    %91 = math.rsqrt %90 : vector<16x1xf32>
    %92 = vector.broadcast %91 : vector<16x1xf32> to vector<16x128xf32>
    %93 = arith.mulf %88, %92 : vector<16x128xf32>
    %94 = vector.broadcast %74 : vector<1x128xf32> to vector<16x128xf32>
    %95 = arith.mulf %93, %94 : vector<16x128xf32>
    %96 = vector.broadcast %75 : vector<1x128xf32> to vector<16x128xf32>
    %97 = arith.addf %95, %96 : vector<16x128xf32>
    %98 = arith.truncf %97 : vector<16x128xf32> to vector<16x128xbf16>
    %cst_25 = arith.constant 0.000000e+00 : f32
    %99 = vector.broadcast %cst_25 : f32 to vector<16x128xf32>
    %c0_26 = arith.constant 0 : index
    %c0_27 = arith.constant 0 : index
    %100 = vector.load %arg6[%c0_26, %c0_27] : memref<128x2048xbf16, #tpu.memory_space<vmem>>, vector<128x1024xbf16>
    %cst_28 = arith.constant dense<0.000000e+00> : vector<16x1024xf32>
    %101 = tpu.matmul %98, %100, %cst_28 {dimension_numbers = #tpu.dot_dimension_numbers<[1], [0], [0], [1], [0, 0, 1, 1], [], []>} : vector<16x128xbf16>, vector<128x1024xbf16>, vector<16x1024xf32> -> vector<16x1024xf32>
    %c0_29 = arith.constant 0 : index
    %c0_30 = arith.constant 0 : index
    %102 = vector.load %arg7[%c0_29, %c0_30] : memref<1x2048xf32, #tpu.memory_space<vmem>>, vector<1x1024xf32>
    %103 = vector.broadcast %102 : vector<1x1024xf32> to vector<16x1024xf32>
    %104 = arith.addf %101, %103 : vector<16x1024xf32>
    %cst_31 = arith.constant 0.000000e+00 : f32
    %105 = vector.broadcast %cst_31 : f32 to vector<16x1024xf32>
    %106 = arith.maximumf %104, %105 : vector<16x1024xf32>
    %107 = arith.truncf %106 : vector<16x1024xf32> to vector<16x1024xbf16>
    %c0_32 = arith.constant 0 : index
    %c0_33 = arith.constant 0 : index
    %108 = vector.load %arg8[%c0_32, %c0_33] : memref<2048x128xbf16, #tpu.memory_space<vmem>>, vector<1024x128xbf16>
    %cst_34 = arith.constant dense<0.000000e+00> : vector<16x128xf32>
    %109 = tpu.matmul %107, %108, %cst_34 {dimension_numbers = #tpu.dot_dimension_numbers<[1], [0], [0], [1], [0, 0, 1, 1], [], []>} : vector<16x1024xbf16>, vector<1024x128xbf16>, vector<16x128xf32> -> vector<16x128xf32>
    %110 = arith.addf %99, %109 : vector<16x128xf32>
    %c0_35 = arith.constant 0 : index
    %c1024 = arith.constant 1024 : index
    %111 = vector.load %arg6[%c0_35, %c1024] : memref<128x2048xbf16, #tpu.memory_space<vmem>>, vector<128x1024xbf16>
    %cst_36 = arith.constant dense<0.000000e+00> : vector<16x1024xf32>
    %112 = tpu.matmul %98, %111, %cst_36 {dimension_numbers = #tpu.dot_dimension_numbers<[1], [0], [0], [1], [0, 0, 1, 1], [], []>} : vector<16x128xbf16>, vector<128x1024xbf16>, vector<16x1024xf32> -> vector<16x1024xf32>
    %c0_37 = arith.constant 0 : index
    %c1024_38 = arith.constant 1024 : index
    %113 = vector.load %arg7[%c0_37, %c1024_38] : memref<1x2048xf32, #tpu.memory_space<vmem>>, vector<1x1024xf32>
    %114 = vector.broadcast %113 : vector<1x1024xf32> to vector<16x1024xf32>
    %115 = arith.addf %112, %114 : vector<16x1024xf32>
    %cst_39 = arith.constant 0.000000e+00 : f32
    %116 = vector.broadcast %cst_39 : f32 to vector<16x1024xf32>
    %117 = arith.maximumf %115, %116 : vector<16x1024xf32>
    %118 = arith.truncf %117 : vector<16x1024xf32> to vector<16x1024xbf16>
    %c1024_40 = arith.constant 1024 : index
    %c0_41 = arith.constant 0 : index
    %119 = vector.load %arg8[%c1024_40, %c0_41] : memref<2048x128xbf16, #tpu.memory_space<vmem>>, vector<1024x128xbf16>
    %cst_42 = arith.constant dense<0.000000e+00> : vector<16x128xf32>
    %120 = tpu.matmul %118, %119, %cst_42 {dimension_numbers = #tpu.dot_dimension_numbers<[1], [0], [0], [1], [0, 0, 1, 1], [], []>} : vector<16x1024xbf16>, vector<1024x128xbf16>, vector<16x128xf32> -> vector<16x128xf32>
    %121 = arith.addf %110, %120 : vector<16x128xf32>
    %c0_43 = arith.constant 0 : index
    %c0_44 = arith.constant 0 : index
    %122 = vector.load %arg9[%c0_43, %c0_44] : memref<1x128xf32, #tpu.memory_space<vmem>>, vector<1x128xf32>
    %123 = vector.broadcast %122 : vector<1x128xf32> to vector<16x128xf32>
    %124 = arith.addf %121, %123 : vector<16x128xf32>
    %125 = arith.addf %97, %124 : vector<16x128xf32>
    %c0_45 = arith.constant 0 : index
    %c0_46 = arith.constant 0 : index
    %126 = vector.load %arg12[%c0_45, %c0_46] : memref<1x128xf32, #tpu.memory_space<vmem>>, vector<1x128xf32>
    %c0_47 = arith.constant 0 : index
    %c0_48 = arith.constant 0 : index
    %127 = vector.load %arg13[%c0_47, %c0_48] : memref<1x128xf32, #tpu.memory_space<vmem>>, vector<1x128xf32>
    %cst_49 = arith.constant dense<0.000000e+00> : vector<16xf32>
    %128 = vector.multi_reduction <add>, %125, %cst_49 [1] : vector<16x128xf32> to vector<16xf32>
    %129 = vector.shape_cast %128 : vector<16xf32> to vector<16x1xf32>
    %cst_50 = arith.constant 1.280000e+02 : f32
    %130 = vector.broadcast %cst_50 : f32 to vector<16x1xf32>
    %131 = arith.divf %129, %130 : vector<16x1xf32>
    %132 = vector.broadcast %131 : vector<16x1xf32> to vector<16x128xf32>
    %133 = arith.subf %125, %132 : vector<16x128xf32>
    %134 = arith.mulf %133, %133 : vector<16x128xf32>
    %cst_51 = arith.constant dense<0.000000e+00> : vector<16xf32>
    %135 = vector.multi_reduction <add>, %134, %cst_51 [1] : vector<16x128xf32> to vector<16xf32>
    %136 = vector.shape_cast %135 : vector<16xf32> to vector<16x1xf32>
    %cst_52 = arith.constant 1.280000e+02 : f32
    %137 = vector.broadcast %cst_52 : f32 to vector<16x1xf32>
    %138 = arith.divf %136, %137 : vector<16x1xf32>
    %139 = vector.broadcast %131 : vector<16x1xf32> to vector<16x128xf32>
    %140 = arith.subf %125, %139 : vector<16x128xf32>
    %cst_53 = arith.constant 9.99999974E-6 : f32
    %141 = vector.broadcast %cst_53 : f32 to vector<16x1xf32>
    %142 = arith.addf %138, %141 : vector<16x1xf32>
    %143 = math.rsqrt %142 : vector<16x1xf32>
    %144 = vector.broadcast %143 : vector<16x1xf32> to vector<16x128xf32>
    %145 = arith.mulf %140, %144 : vector<16x128xf32>
    %146 = vector.broadcast %126 : vector<1x128xf32> to vector<16x128xf32>
    %147 = arith.mulf %145, %146 : vector<16x128xf32>
    %148 = vector.broadcast %127 : vector<1x128xf32> to vector<16x128xf32>
    %149 = arith.addf %147, %148 : vector<16x128xf32>
    %150 = vector.shape_cast %149 : vector<16x128xf32> to vector<2x8x128xf32>
    %c0_54 = arith.constant 0 : index
    %c0_55 = arith.constant 0 : index
    %c0_56 = arith.constant 0 : index
    %151 = vector.load %arg14[%c0_54, %c0_55, %c0_56] : memref<2x8x128xf32, #tpu.memory_space<vmem>>, vector<2x8x128xf32>
    tpu.vector_store %arg14[%c0_54, %c0_55, %c0_56], %150 {strides = array<i32>} : memref<2x8x128xf32, #tpu.memory_space<vmem>>, vector<2x8x128xf32>,
    return
  }
  func.func @transform_0(%arg0: i32) -> (i32, i32, i32) {
    %c0_i32 = arith.constant 0 : i32
    %c0_i32_0 = arith.constant 0 : i32
    %c0_i32_1 = arith.constant 0 : i32
    return %arg0, %c0_i32, %c0_i32_0 : i32, i32, i32
  }
  func.func @transform_1(%arg0: i32) -> (i32, i32) {
    %c0_i32 = arith.constant 0 : i32
    %c0_i32_0 = arith.constant 0 : i32
    %c0_i32_1 = arith.constant 0 : i32
    return %c0_i32, %c0_i32_0 : i32, i32
  }
  func.func @transform_2(%arg0: i32) -> (i32, i32) {
    %c0_i32 = arith.constant 0 : i32
    %c0_i32_0 = arith.constant 0 : i32
    %c0_i32_1 = arith.constant 0 : i32
    return %c0_i32, %c0_i32_0 : i32, i32
  }
  func.func @transform_3(%arg0: i32) -> (i32, i32) {
    %c0_i32 = arith.constant 0 : i32
    %c0_i32_0 = arith.constant 0 : i32
    %c0_i32_1 = arith.constant 0 : i32
    return %c0_i32, %c0_i32_0 : i32, i32
  }
  func.func @transform_4(%arg0: i32) -> (i32, i32) {
    %c0_i32 = arith.constant 0 : i32
    %c0_i32_0 = arith.constant 0 : i32
    %c0_i32_1 = arith.constant 0 : i32
    return %c0_i32, %c0_i32_0 : i32, i32
  }
  func.func @transform_5(%arg0: i32) -> (i32, i32) {
    %c0_i32 = arith.constant 0 : i32
    %c0_i32_0 = arith.constant 0 : i32
    %c0_i32_1 = arith.constant 0 : i32
    return %c0_i32, %c0_i32_0 : i32, i32
  }
  func.func @transform_6(%arg0: i32) -> (i32, i32) {
    %c0_i32 = arith.constant 0 : i32
    %c0_i32_0 = arith.constant 0 : i32
    %c0_i32_1 = arith.constant 0 : i32
    return %c0_i32, %c0_i32_0 : i32, i32
  }
  func.func @transform_7(%arg0: i32) -> (i32, i32) {
    %c0_i32 = arith.constant 0 : i32
    %c0_i32_0 = arith.constant 0 : i32
    %c0_i32_1 = arith.constant 0 : i32
    return %c0_i32, %c0_i32_0 : i32, i32
  }
  func.func @transform_8(%arg0: i32) -> (i32, i32) {
    %c0_i32 = arith.constant 0 : i32
    %c0_i32_0 = arith.constant 0 : i32
    %c0_i32_1 = arith.constant 0 : i32
    return %c0_i32, %c0_i32_0 : i32, i32
  }
  func.func @transform_9(%arg0: i32) -> (i32, i32) {
    %c0_i32 = arith.constant 0 : i32
    %c0_i32_0 = arith.constant 0 : i32
    %c0_i32_1 = arith.constant 0 : i32
    return %c0_i32, %c0_i32_0 : i32, i32
  }
  func.func @transform_10(%arg0: i32) -> (i32, i32) {
    %c0_i32 = arith.constant 0 : i32
    %c0_i32_0 = arith.constant 0 : i32
    %c0_i32_1 = arith.constant 0 : i32
    return %c0_i32, %c0_i32_0 : i32, i32
  }
  func.func @transform_11(%arg0: i32) -> (i32, i32) {
    %c0_i32 = arith.constant 0 : i32
    %c0_i32_0 = arith.constant 0 : i32
    %c0_i32_1 = arith.constant 0 : i32
    return %c0_i32, %c0_i32_0 : i32, i32
  }
  func.func @transform_12(%arg0: i32) -> (i32, i32) {
    %c0_i32 = arith.constant 0 : i32
    %c0_i32_0 = arith.constant 0 : i32
    %c0_i32_1 = arith.constant 0 : i32
    return %c0_i32, %c0_i32_0 : i32, i32
  }
  func.func @transform_13(%arg0: i32) -> (i32, i32, i32) {
    %c0_i32 = arith.constant 0 : i32
    %c0_i32_0 = arith.constant 0 : i32
    %c0_i32_1 = arith.constant 0 : i32
    return %arg0, %c0_i32, %c0_i32_0 : i32, i32, i32
  }
}

</mosaic_0001>

<bundles_post_ra>
// kernel: tpu_custom_call.1
= control target key start
LH: loop header
LB: loop body
LE: loop exit
PB: predicated region body
PF: predicated region fallthrough
CT: control target
= control target key end

     0   :  { %18 = vsyncpa [#allocation3], 0  ;;  %s5703_s0 = inlined_call_operand.hbm [shape: f32[2,8,128], index: 0, kind: input, shape index: {}]   ;;  %s5704_s1 = inlined_call_operand.hbm [shape: bf16[128,384], index: 1, kind: input, shape index: {}]   ;;  %s5705_s2 = inlined_call_operand.vmem [shape: f32[1,384], index: 2, kind: input, shape index: {}]   ;;  %s5706_s3 = inlined_call_operand.hbm [shape: bf16[128,128], index: 3, kind: input, shape index: {}]   ;;  %s5707_s4 = inlined_call_operand.vmem [shape: f32[1,128], index: 4, kind: input, shape index: {}]   ;;  %s5708_s5 = inlined_call_operand.hbm [shape: bf16[128,2048], index: 5, kind: input, shape index: {}]   ;;  %s5709_s6 = inlined_call_operand.vmem [shape: f32[1,2048], index: 6, kind: input, shape index: {}]   ;;  %s5710_s7 = inlined_call_operand.hbm [shape: bf16[2048,128], index: 7, kind: input, shape index: {}]   ;;  %s5711_s8 = inlined_call_operand.vmem [shape: f32[1,128], index: 8, kind: input, shape index: {}]   ;;  %s5712_s9 = inlined_call_operand.vmem [shape: f32[1,128], index: 9, kind: input, shape index: {}]   ;;  %s5713_s10 = inlined_call_operand.vmem [shape: f32[1,128], index: 10, kind: input, shape index: {}]   ;;  %s5714_s11 = inlined_call_operand.vmem [shape: f32[1,128], index: 11, kind: input, shape index: {}]   ;;  %s5715_s12 = inlined_call_operand.vmem [shape: f32[1,128], index: 12, kind: input, shape index: {}]   ;;  %s5716_s13 = inlined_call_operand.hbm [shape: f32[2,8,128], index: 13, kind: output, shape index: {}]  }
   0x1   :  { %19 = vsyncpa [#allocation6], 0 }
   0x2   :  { %20 = vsyncpa [#allocation9], 0 }
   0x3   :  { %21 = vsyncpa [#allocation4], 0  ;;  %s5194_s25 = smov [#allocation5]   ;;  %s5054_s29 = scalar_lea.hbm %s5704_s1, 3072 }
   0x4   :  { %s39_s26 = sshll.u32 %s5194_s25, 4  ;;  %p5055_p0 = scmp.ne.s32.totalorder %s5704_s1, %s5054_s29  ;;  %s40_s26 = int_to_ptr.vmem [resolvable:$true] %s39_s26 }
   0x5   :  { %p5058_p1 = scmp.lt.u32.totalorder %s5054_s29, %s5704_s1 }
   0x7   :  { %p5060_p2 = pnand %p5058_p1, %p5055_p0 }
   0x9   :  { %5063 = shalt.err (!%p5060_p2)
}
   0xa   :  { %s5064_s17 = scalar_lea.vmem %s40_s26, 3072  ;;  %p5069_p4 = scmp.lt.s32.totalorder %s40_s26, %s40_s26 }
   0xb   :  { %p5065_p3 = scmp.ne.s32.totalorder %s40_s26, %s5064_s17  ;;  %p5070_p5 = scmp.lt.s32.totalorder %s5064_s17, %s5064_s17 }
   0xd   :  { %p5071_p6 = por %p5070_p5, %p5069_p4 }
   0xf   :  { %p5072_p7 = pnand %p5071_p6, %p5065_p3 }
  0x11   :  { %5075 = shalt.err (!%p5072_p7)
}
  0x12   :  { %s5195_s18 = smov 192   ;;  %s5196_s19 = smov 12  }
  0x13   :  { %45 = dma.hbm_to_vmem [thread:$0]  %s5704_s1, 3072, %s40_s26, [#allocation6], %s5195_s18, %s5195_s18, %s5196_s19  }
  0x14   :  { %s5197_s22 = smov [#allocation8]   ;;  %s5198_s24 = smov [#allocation2]  }
  0x15   :  { %s67_s23 = sshll.u32 %s5197_s22, 4  ;;  %s27_s25 = sshll.u32 %s5198_s24, 4  ;;  %s68_s23 = int_to_ptr.vmem [resolvable:$true] %s67_s23  ;;  %s28_s25 = int_to_ptr.vmem [resolvable:$true] %s27_s25 }
  0x16   :  { %s5076_s29 = scalar_lea.hbm %s5708_s5, 16384 }
  0x17   :  { %p5077_p8 = scmp.ne.s32.totalorder %s5708_s5, %s5076_s29  ;;  %p5080_p9 = scmp.lt.u32.totalorder %s5076_s29, %s5708_s5 }
  0x19   :  { %p5082_p10 = pnand %p5080_p9, %p5077_p8 }
  0x1b   :  { %5085 = shalt.err (!%p5082_p10)
}
  0x1c   :  { %s5086_s1 = scalar_lea.vmem %s68_s23, 16384  ;;  %p5091_p12 = scmp.lt.s32.totalorder %s68_s23, %s68_s23 }
  0x1d   :  { %p5087_p11 = scmp.ne.s32.totalorder %s68_s23, %s5086_s1  ;;  %p5092_p13 = scmp.lt.s32.totalorder %s5086_s1, %s5086_s1 }
  0x1f   :  { %p5093_p0 = por %p5092_p13, %p5091_p12 }
  0x21   :  { %p5094_p1 = pnand %p5093_p0, %p5087_p11 }
  0x23   :  { %5097 = shalt.err (!%p5094_p1)
}
  0x24   :  { %s5199_s26 = smov 1024   ;;  %s5200_s17 = smov 64  }
  0x25   :  { %73 = dma.hbm_to_vmem [thread:$0]  %s5708_s5, 16384, %s68_s23, [#allocation9], %s5199_s26, %s5199_s26, %s5200_s17  }
  0x26   :  { %s5098_s22 = scalar_lea.hbm %s5703_s0, 256 }
  0x27   :  { %p5099_p2 = scmp.ne.s32.totalorder %s5703_s0, %s5098_s22  ;;  %p5102_p3 = scmp.lt.u32.totalorder %s5098_s22, %s5703_s0 }
  0x29   :  { %p5104_p4 = pnand %p5102_p3, %p5099_p2 }
  0x2b   :  { %5107 = shalt.err (!%p5104_p4)
}
  0x2c   :  { %s5108_s30 = scalar_lea.vmem %s28_s25, 256  ;;  %p5113_p6 = scmp.lt.s32.totalorder %s28_s25, %s28_s25 }
  0x2d   :  { %p5109_p5 = scmp.ne.s32.totalorder %s28_s25, %s5108_s30  ;;  %p5114_p7 = scmp.lt.s32.totalorder %s5108_s30, %s5108_s30 }
  0x2f   :  { %p5115_p8 = por %p5114_p7, %p5113_p6 }
  0x31   :  { %p5116_p9 = pnand %p5115_p8, %p5109_p5 }
  0x33   :  { %5119 = shalt.err (!%p5116_p9)
}
  0x34   :  { %s5201_s5 = smov 128   ;;  %s5202_s23 = smov 8  }
  0x35   :  { %33 = dma.hbm_to_vmem [thread:$0]  %s5703_s0, 256, %s28_s25, [#allocation3], %s5201_s5, %s5201_s5, %s5202_s23  }
  0x36   :  { %s5203_s16 = smov [#allocation7]   ;;  %s5120_s19 = scalar_lea.hbm %s5706_s3, 1024 }
  0x37   :  { %s53_s1 = sshll.u32 %s5203_s16, 4  ;;  %p5121_p10 = scmp.ne.s32.totalorder %s5706_s3, %s5120_s19  ;;  %s54_s1 = int_to_ptr.vmem [resolvable:$true] %s53_s1 }
  0x38   :  { %p5124_p11 = scmp.lt.u32.totalorder %s5120_s19, %s5706_s3 }
  0x3a   :  { %p5126_p12 = pnand %p5124_p11, %p5121_p10 }
  0x3c   :  { %5129 = shalt.err (!%p5126_p12)
}
  0x3d   :  { %s5130_s27 = scalar_lea.vmem %s54_s1, 1024  ;;  %p5135_p0 = scmp.lt.s32.totalorder %s54_s1, %s54_s1 }
  0x3e   :  { %p5131_p13 = scmp.ne.s32.totalorder %s54_s1, %s5130_s27  ;;  %p5136_p1 = scmp.lt.s32.totalorder %s5130_s27, %s5130_s27 }
  0x40   :  { %p5137_p2 = por %p5136_p1, %p5135_p0 }
  0x42   :  { %p5138_p3 = pnand %p5137_p2, %p5131_p13 }
  0x44   :  { %5141 = shalt.err (!%p5138_p3)
}
  0x45   :  { %s5204_s0 = smov 4   ;;  %s5205_s29 = smov [#allocation10]  }
  0x46   :  { %59 = dma.hbm_to_vmem [thread:$0]  %s5706_s3, 1024, %s54_s1, [#allocation6], %s5200_s17, %s5200_s17, %s5204_s0  }
  0x47   :  { %s81_s30 = sshll.u32 %s5205_s29, 4  ;;  %s5142_s16 = scalar_lea.hbm %s5710_s7, 16384  ;;  %s82_s30 = int_to_ptr.vmem [resolvable:$true] %s81_s30 }
  0x48   :  { %p5143_p4 = scmp.ne.s32.totalorder %s5710_s7, %s5142_s16  ;;  %p5146_p5 = scmp.lt.u32.totalorder %s5142_s16, %s5710_s7 }
  0x4a   :  { %p5148_p6 = pnand %p5146_p5, %p5143_p4 }
  0x4c   :  { %5151 = shalt.err (!%p5148_p6)
}
  0x4d   :  { %s5152_s21 = scalar_lea.vmem %s82_s30, 16384  ;;  %p5157_p8 = scmp.lt.s32.totalorder %s82_s30, %s82_s30 }
  0x4e   :  { %p5153_p7 = scmp.ne.s32.totalorder %s82_s30, %s5152_s21  ;;  %p5158_p9 = scmp.lt.s32.totalorder %s5152_s21, %s5152_s21 }
  0x50   :  { %p5159_p10 = por %p5158_p9, %p5157_p8 }
  0x52   :  { %p5160_p11 = pnand %p5159_p10, %p5153_p7 }
  0x54   :  { %5163 = shalt.err (!%p5160_p11)
}
  0x55   :  { %87 = dma.hbm_to_vmem [thread:$0]  %s5710_s7, 16384, %s82_s30, [#allocation9], %s5200_s17, %s5200_s17, %s5204_s0  }
  0x56   :  { %5186 = dma.done.wait [#allocation3], 256  }
  0x57   :  { %5187 = vsyncadd [#allocation3], 4294967040 }
  0x58   :  { %5188 = dma.done.wait [#allocation6], 4096  }
  0x59   :  { %5189 = vsyncadd [#allocation6], 4294963200 }
  0x5a   :  { %5190 = dma.done.wait [#allocation9], 32768  }
  0x5b   :  { %5191 = vsyncadd [#allocation9], 4294934528  ;;  %v5206_v0 = vmov 0   ;;  %v5207_v1 = vmov 0.0   ;;  %v4844_v2 = vld [vmem:[#allocation5 + $0x4] ss:$12 sps:$4 sm:$0xff]   ;;  %v151_v29 = vlaneseq }
  0x5c   :  { %326 = vmatprep.mubr.bf16.mxu0 %v5206_v0  ;;  %4690 = vmatprep.subr.bf16.mxu1 %v5207_v1  ;;  %v4846_v3 = vld [vmem:[#allocation5] ss:$12 sps:$4 sm:$0xff]   ;;  %v4847_v4 = vld [vmem:[#allocation5 + $0x1c] ss:$12 sps:$4 sm:$0xff]   ;;  %v4849_v5 = vld [vmem:[#allocation5 + $0x18] ss:$12 sps:$4 sm:$0xff]  }
  0x5d   :  { %294 = vmatprep.subr.bf16.mxu0 %v4844_v2  ;;  %v4850_v6 = vld [vmem:[#allocation5 + $0x34] ss:$12 sps:$4 sm:$0xff]   ;;  %v4852_v7 = vld [vmem:[#allocation5 + $0x30] ss:$12 sps:$4 sm:$0xff]   ;;  %v4853_v8 = vld [vmem:[#allocation5 + $0x4c] ss:$12 sps:$4 sm:$0xff]  }
  0x5e   :  { %295 = vmatpush1.bf16.msra.mxu0 %v4846_v3  ;;  %v4855_v9 = vld [vmem:[#allocation5 + $0x48] ss:$12 sps:$4 sm:$0xff]   ;;  %v4856_v10 = vld [vmem:[#allocation5 + $0x64] ss:$12 sps:$4 sm:$0xff]   ;;  %v4869_v12 = vld [vmem:[#allocation5 + $0x20] ss:$12 sps:$4 sm:$0xff]  }
  0x5f   :  { %296 = vmatprep.subr.bf16.mxu0 %v4847_v4  ;;  %v4868_v11 = vld [vmem:[#allocation5 + $0x8] ss:$12 sps:$4 sm:$0xff]   ;;  %v4858_v13 = vld [vmem:[#allocation5 + $0x60] ss:$12 sps:$4 sm:$0xff]   ;;  %v4870_v15 = vld [vmem:[#allocation5 + $0x38] ss:$12 sps:$4 sm:$0xff]  }
  0x60   :  { %4691 = vmatpush3.bf16.msra.mxu1 %v4868_v11  ;;  %v4859_v14 = vld [vmem:[#allocation5 + $0x7c] ss:$12 sps:$4 sm:$0xff]   ;;  %v4861_v16 = vld [vmem:[#allocation5 + $0x78] ss:$12 sps:$4 sm:$0xff]   ;;  %v4862_v17 = vld [vmem:[#allocation5 + $0x94] ss:$12 sps:$4 sm:$0xff]  }
  0x61   :  { %4692 = vmatprep.subr.bf16.mxu1 %v5207_v1  ;;  %v4871_v18 = vld [vmem:[#allocation5 + $0x50] ss:$12 sps:$4 sm:$0xff]   ;;  %v4865_v20 = vld [vmem:[#allocation5 + $0xac] ss:$12 sps:$4 sm:$0xff]   ;;  %v4872_v21 = vld [vmem:[#allocation5 + $0x68] ss:$12 sps:$4 sm:$0xff]  }
  0x62   :  { %297 = vmatpush1.bf16.msra.mxu0 %v4849_v5  ;;  %v4864_v19 = vld [vmem:[#allocation5 + $0x90] ss:$12 sps:$4 sm:$0xff]   ;;  %v4867_v22 = vld [vmem:[#allocation5 + $0xa8] ss:$12 sps:$4 sm:$0xff]   ;;  %v4873_v25 = vld [vmem:[#allocation5 + $0x80] ss:$12 sps:$4 sm:$0xff]  }
  0x63   :  { %298 = vmatprep.subr.bf16.mxu0 %v4850_v6  ;;  %v114_v23 = vld [vmem:[#allocation2] sm:$0xff]  ;;  %v115_v24 = vld [vmem:[#allocation2 + $0x8] sm:$0xff]  ;;  %vm5208_vm0 = vmmov 0   ;;  %v5367_v30 = vshrl.u32 %v151_v29, 7  ;;  %vm434_vm1 = vcmask 261120   ;;  %s5210_s24 = smov 32  }
  0x64   :  { %4693 = vmatpush3.bf16.msra.mxu1 %v4869_v12  ;;  %v116_v26 = vpack.c.bf16 %v115_v24, %v114_v23  ;;  %v4874_v27 = vld [vmem:[#allocation5 + $0x98] ss:$12 sps:$4 sm:$0xff]   ;;  %v4875_v28 = vld [vmem:[#allocation5 + $0xb0] ss:$12 sps:$4 sm:$0xff]   ;;  %4706 = vmatprep.mubr.msk.bf16.mxu1 %vm5208_vm0, %v5207_v1  ;;  %vm903_vm2 = vcmask 1043456   ;;  %vm803_vm3 = vcmask 64512  }
  0x65   :  { %4694 = vmatprep.subr.bf16.mxu1 %v5207_v1  ;;  %v5370_v31 = vsub.s32 0, %v5367_v30  ;;  %v5375_v32 = vld [vmem:[%s5705_s2] sm:$0x7]  ;;  %v5378_v33 = vsub.s32 1, %v5367_v30  ;;  %s5209_s2 = smov 96   ;;  %v5409_v62 = vsub.s32 2, %v5367_v30 }
  0x66   :  { %299 = vmatpush1.bf16.msra.mxu0 %v4852_v7  ;;  %vm1301_vm4 = vcmask 523264   ;;  %vm1306_vm5 = vcmask 785408   ;;  %s5211_s18 = smov [#allocation11]  }
  0x67   :  { %300 = vmatprep.subr.bf16.mxu0 %v4853_v8  ;;  %v154_v34 = vrot.slane %v5375_v32, %v5370_v31  ;;  %v158_v35 = vrot.slane %v5375_v32, %v5378_v33  ;;  %v162_v5 = vrot.slane %v5375_v32, %v5409_v62  ;;  %s4127_s19 = sshll.u32 %s5211_s18, 4  ;;  %s4128_s19 = int_to_ptr.vmem [resolvable:$true] %s4127_s19 }
  0x68   :  { %4695 = vmatpush3.bf16.msra.mxu1 %v4870_v15  ;;  %s5164_s20 = scalar_lea.vmem %s4128_s19, 256  ;;  %p5169_p13 = scmp.lt.s32.totalorder %s4128_s19, %s4128_s19 }
  0x69   :  { %4696 = vmatprep.subr.bf16.mxu1 %v5207_v1  ;;  %p5165_p12 = scmp.ne.s32.totalorder %s4128_s19, %s5164_s20  ;;  %p5170_p0 = scmp.lt.s32.totalorder %s5164_s20, %s5164_s20 }
  0x6a   :  { %301 = vmatpush1.bf16.msra.mxu0 %v4855_v9 }
  0x6b   :  { %302 = vmatprep.subr.bf16.mxu0 %v4856_v10  ;;  %p5171_p1 = por %p5170_p0, %p5169_p13 }
  0x6c   :  { %4697 = vmatpush3.bf16.msra.mxu1 %v4871_v18 }
  0x6d   :  { %4698 = vmatprep.subr.bf16.mxu1 %v5207_v1  ;;  %p5172_p2 = pnand %p5171_p1, %p5165_p12 }
  0x6e   :  { %303 = vmatpush1.bf16.msra.mxu0 %v4858_v13 }
  0x6f   :  { %304 = vmatprep.subr.bf16.mxu0 %v4859_v14 }
  0x70   :  { %4699 = vmatpush3.bf16.msra.mxu1 %v4872_v21 }
  0x71   :  { %4700 = vmatprep.subr.bf16.mxu1 %v5207_v1 }
  0x72   :  { %305 = vmatpush1.bf16.msra.mxu0 %v4861_v16 }
  0x73   :  { %306 = vmatprep.subr.bf16.mxu0 %v4862_v17 }
  0x74   :  { %4701 = vmatpush3.bf16.msra.mxu1 %v4873_v25 }
  0x75   :  { %4702 = vmatprep.subr.bf16.mxu1 %v5207_v1 }
  0x76   :  { %307 = vmatpush1.bf16.msra.mxu0 %v4864_v19 }
  0x77   :  { %308 = vmatprep.subr.bf16.mxu0 %v4865_v20 }
  0x78   :  { %4703 = vmatpush3.bf16.msra.mxu1 %v4874_v27 }
  0x79   :  { %4704 = vmatprep.subr.bf16.mxu1 %v5207_v1 }
  0x7a   :  { %309 = vmatpush1.bf16.msra.mxu0 %v4867_v22 }
  0x7b   :  { %4734 = vmatprep.subr.bf16.mxu0 %v5207_v1 }
  0x7c   :  { %4705 = vmatpush3.bf16.msra.mxu1 %v4875_v28 }
  0x7d   :  { %327 = vmatmul.mubr.bf16.vlgmr.msra.gmra.mrb[0].mxu0 %v116_v26  ;;  %4710 = vmatprep.subr.bf16.mxu1 %v5207_v1 }
  0x7e   :  { %4736 = vmatprep.mubr.msk.bf16.mxu0 %vm5208_vm0, %v5207_v1 }
  0x7f   :  { %4707 = vmatmul.mubr.bf16.vlgmr.msra.gmra.mrb[0].mxu1 %v116_v26 }
  0x80   :  { %4712 = vmatprep.mubr.msk.bf16.mxu1 %vm5208_vm0, %v5207_v1 }
 0x150   :  { %v328_v36 = vpop.f32.mrb[0].mxu0 }
 0x151   :  { %v329_v37 = vadd.f32 %v328_v36, %v154_v34  ;;  %v330_v38 = vpop.f32.mrb[1].mxu0 }
 0x152   :  { %v331_v39 = vadd.f32 %v330_v38, %v158_v35  ;;  %v332_v40 = vpop.f32.mrb[2].mxu0  ;;  %v371_v52 = vpop.f32.mrb[0].mxu1 }
 0x153   :  { %v334_v41 = vpop.f32.mrb[3].mxu0  ;;  %v378_v42 = vmul.f32 0.17677669, %v329_v37  ;;  %v333_v45 = vadd.f32 %v332_v40, %v154_v34  ;;  %v4708_v53 = vpop.f32.mrb[1].mxu1  ;;  %v372_v8 = vadd.f32 %v371_v52, %v162_v5 }
 0x154   :  { %v4460_v43 = vpack.c.bf16 %v331_v39, %v331_v39  ;;  %v335_v44 = vadd.f32 %v334_v41, %v158_v35  ;;  %v374_v54 = vpop.f32.mrb[2].mxu1 }
 0x155   :  { %v4458_v48 = vpack.c.bf16 %v378_v42, %v378_v42  ;;  %v379_v49 = vmul.f32 0.17677669, %v333_v45  ;;  %v4709_v55 = vpop.f32.mrb[3].mxu1  ;;  %v5429_v11 = vpack.c.bf16 %v372_v8, %v372_v8  ;;  %v375_v13 = vadd.f32 %v374_v54, %v162_v5 }
 0x156   :  { %v4461_v46 = vpack.c.bf16 %v335_v44, %v335_v44  ;;  %405 = vrot.lane.b32.xlu0 %v4460_v43, %s5209_s2  ;;  %v439_v47 = vsel %vm434_vm1, %v4460_v43, 0 }
 0x157   :  { %4711 = vmatpush3.bf16.xpose.msra.mxu1 %v439_v47  ;;  %v4459_v50 = vpack.c.bf16 %v379_v49, %v379_v49  ;;  %v905_v15 = vsel %vm903_vm2, %v5429_v11, 0  ;;  %v5439_v17 = vpack.c.bf16 %v375_v13, %v375_v13 }
 0x158   :  { %407 = vrot.lane.b32.xlu1 %v4461_v46, %s5209_s2  ;;  %4716 = vmatprep.subr.bf16.mxu1 %v5207_v1  ;;  %v485_v51 = vsel %vm434_vm1, %v4461_v46, 0 }
 0x159   :  { %v951_v18 = vsel %vm903_vm2, %v5439_v17, 0 }
 0x15a   :  { %388 = vrot.lane.b32.xlu0 %v4458_v48, %s5209_s2 }
 0x15c   :  { %411 = vrot.lane.b32.xlu1 %v4461_v46, %s5200_s17 }
 0x15e   :  { %409 = vrot.lane.b32.xlu0 %v4460_v43, %s5200_s17  ;;  %4713 = vmatmul.mubr.msk.bf16.vlgmr.msra.gmra.mrb[4].mxu1 %vm434_vm1, %v4458_v48 }
 0x15f   :  { %4717 = vmatpush3.bf16.xpose.msra.mxu1 %v485_v51  ;;  %4718 = vmatprep.mubr.msk.bf16.mxu1 %vm5208_vm0, %v5207_v1 }
 0x160   :  { %390 = vrot.lane.b32.xlu1 %v4459_v50, %s5209_s2  ;;  %4722 = vmatprep.subr.bf16.mxu1 %v5207_v1 }
 0x162   :  { %392 = vrot.lane.b32.xlu0 %v4458_v48, %s5200_s17 }
 0x164   :  { %394 = vrot.lane.b32.xlu1 %v4459_v50, %s5200_s17 }
 0x166   :  { %413 = vrot.lane.b32.xlu0 %v4460_v43, %s5210_s24  ;;  %4719 = vmatmul.mubr.msk.bf16.vlgmr.msra.gmra.mrb[8].mxu1 %vm434_vm1, %v4459_v50 }
 0x167   :  { %4724 = vmatprep.mubr.msk.bf16.mxu1 %vm5208_vm0, %v5207_v1 }
 0x168   :  { %415 = vrot.lane.b32.xlu1 %v4461_v46, %s5210_s24 }
 0x16a   :  { %396 = vrot.lane.b32.xlu0 %v4458_v48, %s5210_s24 }
 0x16c   :  { %398 = vrot.lane.b32.xlu1 %v4459_v50, %s5210_s24 }
 0x1c8   :  { %v406_v56 = vpop.permute.xlu0 %405 }
 0x1c9   :  { %v531_v57 = vsel %vm434_vm1, %v406_v56, 0 }
 0x1ca   :  { %v408_v58 = vpop.permute.xlu1 %407  ;;  %4723 = vmatpush3.bf16.xpose.msra.mxu1 %v531_v57 }
 0x1cb   :  { %4728 = vmatprep.subr.bf16.mxu1 %v5207_v1  ;;  %v577_v63 = vsel %vm434_vm1, %v408_v58, 0 }
 0x1cc   :  { %v389_v59 = vpop.permute.xlu0 %388 }
 0x1ce   :  { %v412_v60 = vpop.permute.xlu1 %411 }
 0x1cf   :  { %v669_v9 = vsel %vm434_vm1, %v412_v60, 0 }
 0x1d0   :  { %v410_v61 = vpop.permute.xlu0 %409 }
 0x1d1   :  { %v623_v2 = vsel %vm434_vm1, %v410_v61, 0  ;;  %4725 = vmatmul.mubr.msk.bf16.vlgmr.msra.gmra.mrb[12].mxu1 %vm434_vm1, %v389_v59 }
 0x1d2   :  { %v391_v3 = vpop.permute.xlu1 %390  ;;  %4729 = vmatpush3.bf16.xpose.msra.mxu1 %v577_v63  ;;  %4735 = vmatpush3.bf16.xpose.msra.mxu0 %v623_v2 }
 0x1d3   :  { %4730 = vmatprep.mubr.msk.bf16.mxu1 %vm5208_vm0, %v5207_v1  ;;  %4740 = vmatprep.subr.bf16.mxu1 %v5207_v1 }
 0x1d4   :  { %v393_v4 = vpop.permute.xlu0 %392  ;;  %4746 = vmatprep.subr.bf16.mxu0 %v5207_v1 }
 0x1d6   :  { %v395_v6 = vpop.permute.xlu1 %394 }
 0x1d8   :  { %v414_v7 = vpop.permute.xlu0 %413 }
 0x1d9   :  { %v715_v10 = vsel %vm434_vm1, %v414_v7, 0  ;;  %4731 = vmatmul.mubr.msk.bf16.vlgmr.msra.gmra.mrb[16].mxu1 %vm434_vm1, %v391_v3  ;;  %4737 = vmatmul.mubr.msk.bf16.vlgmr.msra.gmra.mrb[4].mxu0 %vm434_vm1, %v393_v4 }
 0x1da   :  { %4741 = vmatpush3.bf16.xpose.msra.mxu1 %v669_v9  ;;  %4747 = vmatpush3.bf16.xpose.msra.mxu0 %v715_v10  ;;  %v416_v12 = vpop.permute.xlu1 %415 }
 0x1db   :  { %4742 = vmatprep.mubr.msk.bf16.mxu1 %vm5208_vm0, %v5207_v1  ;;  %4748 = vmatprep.mubr.msk.bf16.mxu0 %vm5208_vm0, %v5207_v1  ;;  %v761_v16 = vsel %vm434_vm1, %v416_v12, 0 }
 0x1dc   :  { %4752 = vmatprep.subr.bf16.mxu1 %v5207_v1  ;;  %4758 = vmatprep.subr.bf16.mxu0 %v5207_v1  ;;  %v397_v14 = vpop.permute.xlu0 %396 }
 0x1de   :  { %v399_v19 = vpop.permute.xlu1 %398 }
 0x1e1   :  { %4743 = vmatmul.mubr.msk.bf16.vlgmr.msra.gmra.mrb[20].mxu1 %vm434_vm1, %v395_v6  ;;  %4749 = vmatmul.mubr.msk.bf16.vlgmr.msra.gmra.mrb[8].mxu0 %vm434_vm1, %v397_v14 }
 0x1e2   :  { %4753 = vmatpush3.bf16.xpose.msra.mxu1 %v761_v16  ;;  %4754 = vmatprep.mubr.msk.bf16.mxu1 %vm5208_vm0, %v5207_v1 }
 0x1e3   :  { %4764 = vmatprep.subr.bf16.mxu1 %v5207_v1  ;;  %4759 = vmatpush3.bf16.msra.mxu0 %v905_v15 }
 0x1e4   :  { %4760 = vmatprep.mubr.msk.bf16.mxu0 %vm5208_vm0, %v5207_v1  ;;  %4770 = vmatprep.subr.bf16.mxu0 %v5207_v1 }
 0x1e9   :  { %4755 = vmatmul.mubr.msk.bf16.vlgmr.msra.gmra.mrb[24].mxu1 %vm434_vm1, %v399_v19 }
 0x1ea   :  { %4765 = vmatpush3.bf16.msra.mxu1 %v951_v18  ;;  %4766 = vmatprep.mubr.msk.bf16.mxu1 %vm5208_vm0, %v5207_v1 }
 0x1eb   :  { %4776 = vmatprep.subr.bf16.mxu1 %v5207_v1 }
 0x231   :  { %v475_v20 = vpop.f32.mrb[4].mxu1 }
 0x232   :  { %v4714_v21 = vpop.f32.mrb[5].mxu1  ;;  %v804_v22 = vsel %vm803_vm3, %v475_v20, -inf }
 0x233   :  { %805 = vmax.xlane.f32.xlu0 %v804_v22  ;;  %v478_v23 = vpop.f32.mrb[6].mxu1 }
 0x234   :  { %v4715_v24 = vpop.f32.mrb[7].mxu1 }
 0x239   :  { %v521_v25 = vpop.f32.mrb[8].mxu1 }
 0x23a   :  { %v4720_v26 = vpop.f32.mrb[9].mxu1  ;;  %v807_v27 = vsel %vm803_vm3, %v521_v25, -inf }
 0x23b   :  { %808 = vmax.xlane.f32.xlu1 %v807_v27  ;;  %v524_v28 = vpop.f32.mrb[10].mxu1 }
 0x23c   :  { %v4721_v29 = vpop.f32.mrb[11].mxu1 }
 0x2a4   :  { %v567_v32 = vpop.f32.mrb[12].mxu1 }
 0x2a5   :  { %v4726_v34 = vpop.f32.mrb[13].mxu1  ;;  %v810_v35 = vsel %vm803_vm3, %v567_v32, -inf }
 0x2a6   :  { %811 = vmax.xlane.f32.xlu0 %v810_v35  ;;  %v570_v36 = vpop.f32.mrb[14].mxu1 }
 0x2a7   :  { %v4727_v37 = vpop.f32.mrb[15].mxu1 }
 0x2ac   :  { %v613_v38 = vpop.f32.mrb[16].mxu1  ;;  %v659_v39 = vpop.f32.mrb[4].mxu0 }
 0x2ad   :  { %v4732_v40 = vpop.f32.mrb[17].mxu1  ;;  %v4738_v41 = vpop.f32.mrb[5].mxu0  ;;  %v816_v42 = vsel %vm803_vm3, %v659_v39, -inf  ;;  %v813_v43 = vsel %vm803_vm3, %v613_v38, -inf }
 0x2ae   :  { %v662_v44 = vpop.f32.mrb[6].mxu0  ;;  %817 = vmax.xlane.f32.xlu1 %v816_v42  ;;  %814 = vmax.xlane.f32.xlu0 %v813_v43  ;;  %v616_v45 = vpop.f32.mrb[18].mxu1 }
 0x2af   :  { %v4733_v46 = vpop.f32.mrb[19].mxu1  ;;  %v4739_v47 = vpop.f32.mrb[7].mxu0 }
 0x2b4   :  { %v5456_v48 = vpop.f32.mrb[20].mxu1  ;;  %v5458_v49 = vpop.f32.mrb[8].mxu0 }
 0x2b5   :  { %v4744_v50 = vpop.f32.mrb[21].mxu1  ;;  %v4750_v51 = vpop.f32.mrb[9].mxu0  ;;  %v822_v52 = vsel %vm803_vm3, %v5458_v49, -inf  ;;  %v819_v53 = vsel %vm803_vm3, %v5456_v48, -inf }
 0x2b6   :  { %v754_v54 = vpop.f32.mrb[10].mxu0  ;;  %823 = vmax.xlane.f32.xlu1 %v822_v52  ;;  %820 = vmax.xlane.f32.xlu0 %v819_v53  ;;  %v708_v55 = vpop.f32.mrb[22].mxu1 }
 0x2b7   :  { %v4745_v56 = vpop.f32.mrb[23].mxu1  ;;  %v4751_v57 = vpop.f32.mrb[11].mxu0 }
 0x2bc   :  { %v797_v58 = vpop.f32.mrb[24].mxu1 }
 0x2bd   :  { %v4756_v59 = vpop.f32.mrb[25].mxu1  ;;  %v825_v60 = vsel %vm803_vm3, %v797_v58, -inf }
 0x2be   :  { %826 = vmax.xlane.f32.xlu0 %v825_v60  ;;  %v800_v61 = vpop.f32.mrb[26].mxu1 }
 0x2bf   :  { %v4757_v63 = vpop.f32.mrb[27].mxu1 }
 0x2c0   :  { %v806_v5 = vpop.xlane.xlu0 %805 }
 0x2c1   :  { %v828_v6 = vsub.f32 %v475_v20, %v806_v5 }
 0x2c3   :  { %v836_v9 = vmul.f32 1.442695, %v828_v6 }
 0x2c7   :  { %422 = vrot.lane.b32.xlu1 %v5429_v11, %s5209_s2 }
 0x2c8   :  { %v809_v2 = vpop.xlane.xlu1 %808 }
 0x2c9   :  { %v829_v3 = vsub.f32 %v521_v25, %v809_v2 }
 0x2cb   :  { %v838_v4 = vmul.f32 1.442695, %v829_v3 }
 0x2cd   :  { %5012 = vpow2.f32 %v838_v4 }
 0x2ce   :  { %5014 = vpow2.f32 %v836_v9 }
 0x2d7   :  { %v5013_v7 = vpop.eup %5012 }
 0x2d8   :  { %v855_v8 = vsel %vm803_vm3, %v5013_v7, 0.0  ;;  %v5015_v10 = vpop.eup %5014 }
 0x2d9   :  { %856 = vadd.xlane.f32.xlu0 %v855_v8  ;;  %v852_v12 = vsel %vm803_vm3, %v5015_v10, 0.0 }
 0x2eb   :  { %853 = vadd.xlane.f32.xlu1 %v852_v12 }
 0x333   :  { %v812_v13 = vpop.xlane.xlu0 %811 }
 0x334   :  { %v830_v14 = vsub.f32 %v567_v32, %v812_v13 }
 0x336   :  { %v840_v15 = vmul.f32 1.442695, %v830_v14 }
 0x338   :  { %5016 = vpow2.f32 %v840_v15 }
 0x33b   :  { %v818_v16 = vpop.xlane.xlu1 %817  ;;  %v815_v18 = vpop.xlane.xlu0 %814 }
 0x33c   :  { %v832_v19 = vsub.f32 %v659_v39, %v818_v16  ;;  %v831_v21 = vsub.f32 %v613_v38, %v815_v18 }
 0x33e   :  { %v844_v22 = vmul.f32 1.442695, %v832_v19  ;;  %v842_v20 = vmul.f32 1.442695, %v831_v21 }
 0x340   :  { %5018 = vpow2.f32 %v844_v22 }
 0x341   :  { %5020 = vpow2.f32 %v842_v20 }
 0x342   :  { %v5017_v23 = vpop.eup %5016 }
 0x343   :  { %v858_v24 = vsel %vm803_vm3, %v5017_v23, 0.0  ;;  %v821_v29 = vpop.xlane.xlu0 %820  ;;  %v824_v35 = vpop.xlane.xlu1 %823 }
 0x344   :  { %859 = vadd.xlane.f32.xlu1 %v858_v24  ;;  %v833_v36 = vsub.f32 %v5456_v48, %v821_v29  ;;  %v834_v37 = vsub.f32 %v5458_v49, %v824_v35 }
 0x346   :  { %v846_v38 = vmul.f32 1.442695, %v833_v36  ;;  %v848_v42 = vmul.f32 1.442695, %v834_v37 }
 0x347   :  { %v423_v43 = vpop.permute.xlu1 %422 }
 0x348   :  { %v997_v56 = vsel %vm903_vm2, %v423_v43, 0 }
 0x34a   :  { %v5470_v25 = vpop.eup %5018 }
 0x34b   :  { %v5472_v26 = vpop.eup %5020  ;;  %v864_v27 = vsel %vm803_vm3, %v5470_v25, 0.0  ;;  %v827_v32 = vpop.xlane.xlu0 %826 }
 0x34c   :  { %865 = vadd.xlane.f32.xlu1 %v864_v27  ;;  %v861_v28 = vsel %vm803_vm3, %v5472_v26, 0.0  ;;  %v835_v39 = vsub.f32 %v797_v58, %v827_v32 }
 0x34d   :  { %862 = vadd.xlane.f32.xlu0 %v861_v28 }
 0x34e   :  { %v850_v44 = vmul.f32 1.442695, %v835_v39 }
 0x35d   :  { %426 = vrot.lane.b32.xlu1 %v5429_v11, %s5200_s17 }
 0x361   :  { %428 = vrot.lane.b32.xlu1 %v5439_v17, %s5200_s17 }
 0x363   :  { %424 = vrot.lane.b32.xlu0 %v5439_v17, %s5209_s2 }
 0x366   :  { %v857_v34 = vpop.xlane.xlu0 %856 }
 0x367   :  { %5022 = vrcp.f32 %v857_v34 }
 0x368   :  { %5024 = vpow2.f32 %v846_v38 }
 0x369   :  { %5026 = vpow2.f32 %v848_v42 }
 0x36a   :  { %5028 = vpow2.f32 %v850_v44 }
 0x371   :  { %v5023_v40 = vpop.eup %5022 }
 0x372   :  { %v885_v41 = vmul.f32 %v5023_v40, %v5013_v7  ;;  %v5489_v47 = vpop.eup %5024 }
 0x373   :  { %v5491_v48 = vpop.eup %5026  ;;  %v867_v49 = vsel %vm803_vm3, %v5489_v47, 0.0 }
 0x374   :  { %v893_v45 = vpack.c.bf16 %v885_v41, %v885_v41  ;;  %v5495_v50 = vpop.eup %5028  ;;  %v870_v53 = vsel %vm803_vm3, %v5491_v48, 0.0  ;;  %v4876_v41 = vld [vmem:[#allocation7] sm:$0xff]  }
 0x375   :  { %v873_v54 = vsel %vm803_vm3, %v5495_v50, 0.0 }
 0x376   :  { %4767 = vmatmul.mubr.msk.bf16.vlgmr.msra.gmra.mrb[28].mxu1 %vm803_vm3, %v893_v45  ;;  %v4877_v45 = vld [vmem:[#allocation7 + $0x8] sm:$0xff]  }
 0x377   :  { %4778 = vmatprep.mubr.msk.bf16.mxu1 %vm5208_vm0, %v5207_v1 }
 0x378   :  { %v854_v46 = vpop.xlane.xlu1 %853 }
 0x379   :  { %5030 = vrcp.f32 %v854_v46 }
 0x382   :  { %868 = vadd.xlane.f32.xlu0 %v867_v49 }
 0x383   :  { %v5031_v51 = vpop.eup %5030 }
 0x384   :  { %v884_v52 = vmul.f32 %v5031_v51, %v5015_v10 }
 0x385   :  { %871 = vadd.xlane.f32.xlu1 %v870_v53  ;;  %v4879_v53 = vld [vmem:[#allocation7 + $0x18] sm:$0xff]  }
 0x386   :  { %874 = vadd.xlane.f32.xlu0 %v873_v54  ;;  %v892_v55 = vpack.c.bf16 %v884_v52, %v884_v52 }
 0x388   :  { %4761 = vmatmul.mubr.msk.bf16.vlgmr.msra.gmra.mrb[12].mxu0 %vm803_vm3, %v892_v55 }
 0x389   :  { %4771 = vmatpush3.bf16.msra.mxu0 %v997_v56  ;;  %4772 = vmatprep.mubr.msk.bf16.mxu0 %vm5208_vm0, %v5207_v1 }
 0x38a   :  { %4782 = vmatprep.subr.bf16.mxu0 %v5207_v1 }
 0x396   :  { %432 = vrot.lane.b32.xlu1 %v5439_v17, %s5210_s24 }
 0x39c   :  { %430 = vrot.lane.b32.xlu0 %v5429_v11, %s5210_s24 }
 0x3d1   :  { %v860_v57 = vpop.xlane.xlu1 %859 }
 0x3d2   :  { %5032 = vrcp.f32 %v860_v57 }
 0x3d9   :  { %v866_v58 = vpop.xlane.xlu1 %865 }
 0x3da   :  { %5034 = vrcp.f32 %v866_v58  ;;  %v863_v59 = vpop.xlane.xlu0 %862 }
 0x3db   :  { %5036 = vrcp.f32 %v863_v59 }
 0x3dc   :  { %v5033_v60 = vpop.eup %5032 }
 0x3dd   :  { %v886_v61 = vmul.f32 %v5033_v60, %v5017_v23  ;;  %v427_v63 = vpop.permute.xlu1 %426  ;;  %v4880_v60 = vld [vmem:[#allocation7 + $0x20] sm:$0xff]  }
 0x3de   :  { %v425_v2 = vpop.permute.xlu0 %424  ;;  %v1089_v5 = vsel %vm903_vm2, %v427_v63, 0  ;;  %v4882_v63 = vld [vmem:[#allocation7 + $0x30] sm:$0xff]  }
 0x3df   :  { %v1043_v3 = vsel %vm903_vm2, %v425_v2, 0  ;;  %v894_v4 = vpack.c.bf16 %v886_v61, %v886_v61  ;;  %v4881_v61 = vld [vmem:[#allocation7 + $0x28] sm:$0xff]   ;;  %v4883_v2 = vld [vmem:[#allocation7 + $0x38] sm:$0xff]  }
 0x3e0   :  { %4777 = vmatpush3.bf16.msra.mxu1 %v1043_v3 }
 0x3e1   :  { %4773 = vmatmul.mubr.msk.bf16.vlgmr.msra.gmra.mrb[16].mxu0 %vm803_vm3, %v894_v4  ;;  %4788 = vmatprep.subr.bf16.mxu1 %v5207_v1  ;;  %v429_v8 = vpop.permute.xlu1 %428 }
 0x3e2   :  { %4783 = vmatpush3.bf16.msra.mxu0 %v1089_v5  ;;  %4784 = vmatprep.mubr.msk.bf16.mxu0 %vm5208_vm0, %v5207_v1  ;;  %v1135_v12 = vsel %vm903_vm2, %v429_v8, 0 }
 0x3e3   :  { %4794 = vmatprep.subr.bf16.mxu0 %v5207_v1 }
 0x3e4   :  { %v5035_v11 = vpop.eup %5034 }
 0x3e5   :  { %v5037_v17 = vpop.eup %5036  ;;  %v888_v6 = vmul.f32 %v5035_v11, %v5470_v25 }
 0x3e6   :  { %v887_v7 = vmul.f32 %v5037_v17, %v5472_v26 }
 0x3e7   :  { %v896_v9 = vpack.c.bf16 %v888_v6, %v888_v6 }
 0x3e8   :  { %v895_v10 = vpack.c.bf16 %v887_v7, %v887_v7 }
 0x3e9   :  { %4785 = vmatmul.mubr.msk.bf16.vlgmr.msra.gmra.mrb[20].mxu0 %vm803_vm3, %v896_v9 }
 0x3ea   :  { %4779 = vmatmul.mubr.msk.bf16.vlgmr.msra.gmra.mrb[32].mxu1 %vm803_vm3, %v895_v10  ;;  %4796 = vmatprep.mubr.msk.bf16.mxu0 %vm5208_vm0, %v5207_v1 }
 0x3eb   :  { %4789 = vmatpush3.bf16.msra.mxu1 %v1135_v12  ;;  %4790 = vmatprep.mubr.msk.bf16.mxu1 %vm5208_vm0, %v5207_v1 }
 0x3ec   :  { %4800 = vmatprep.subr.bf16.mxu1 %v5207_v1 }
 0x40f   :  { %v869_v13 = vpop.xlane.xlu0 %868 }
 0x410   :  { %5038 = vrcp.f32 %v869_v13 }
 0x412   :  { %v872_v14 = vpop.xlane.xlu1 %871 }
 0x413   :  { %5040 = vrcp.f32 %v872_v14  ;;  %v875_v15 = vpop.xlane.xlu0 %874 }
 0x414   :  { %5042 = vrcp.f32 %v875_v15 }
 0x416   :  { %v433_v22 = vpop.permute.xlu1 %432 }
 0x417   :  { %v431_v16 = vpop.permute.xlu0 %430  ;;  %v1227_v26 = vsel %vm903_vm2, %v433_v22, 0 }
 0x418   :  { %v1181_v18 = vsel %vm903_vm2, %v431_v16, 0 }
 0x419   :  { %4795 = vmatpush3.bf16.msra.mxu0 %v1181_v18 }
 0x41a   :  { %v5039_v19 = vpop.eup %5038  ;;  %4806 = vmatprep.subr.bf16.mxu0 %v5207_v1 }
 0x41b   :  { %v889_v21 = vmul.f32 %v5039_v19, %v5489_v47 }
 0x41d   :  { %v5041_v20 = vpop.eup %5040  ;;  %v897_v23 = vpack.c.bf16 %v889_v21, %v889_v21 }
 0x41e   :  { %v5043_v24 = vpop.eup %5042  ;;  %v890_v25 = vmul.f32 %v5041_v20, %v5491_v48  ;;  %v4878_v48 = vld [vmem:[#allocation7 + $0x10] sm:$0xff]  }
 0x41f   :  { %4791 = vmatmul.mubr.msk.bf16.vlgmr.msra.gmra.mrb[36].mxu1 %vm803_vm3, %v897_v23  ;;  %v891_v28 = vmul.f32 %v5043_v24, %v5495_v50 }
 0x420   :  { %4801 = vmatpush3.bf16.msra.mxu1 %v1227_v26  ;;  %v898_v27 = vpack.c.bf16 %v890_v25, %v890_v25  ;;  %4802 = vmatprep.mubr.msk.bf16.mxu1 %vm5208_vm0, %v5207_v1 }
 0x421   :  { %v899_v29 = vpack.c.bf16 %v891_v28, %v891_v28 }
 0x422   :  { %4797 = vmatmul.mubr.msk.bf16.vlgmr.msra.gmra.mrb[24].mxu0 %vm803_vm3, %v898_v27 }
 0x423   :  { %4822 = vmatprep.mubr.msk.bf16.mxu0 %vm5208_vm0, %v5207_v1  ;;  %4807 = vmatpush3.bf16.msra.mxu0 %v4876_v41 }
 0x424   :  { %4808 = vmatprep.subr.bf16.mxu0 %v5207_v1 }
 0x427   :  { %4803 = vmatmul.mubr.msk.bf16.vlgmr.msra.gmra.mrb[40].mxu1 %vm803_vm3, %v899_v29  ;;  %4809 = vmatpush3.bf16.msra.mxu0 %v4877_v45 }
 0x428   :  { %1931 = vmatprep.mubr.bf16.mxu1 %v5206_v0  ;;  %4810 = vmatprep.subr.bf16.mxu0 %v5207_v1 }
 0x42b   :  { %4811 = vmatpush3.bf16.msra.mxu0 %v4878_v48  ;;  %v1474_v48 = vld [vmem:[#allocation8 + $0x8] sm:$0xff] }
 0x42c   :  { %4812 = vmatprep.subr.bf16.mxu0 %v5207_v1 }
 0x42f   :  { %4813 = vmatpush3.bf16.msra.mxu0 %v4879_v53  ;;  %v1485_v53 = vld [vmem:[#allocation8 + $0xc0] sm:$0xff] }
 0x430   :  { %4814 = vmatprep.subr.bf16.mxu0 %v5207_v1 }
 0x433   :  { %4815 = vmatpush3.bf16.msra.mxu0 %v4880_v60 }
 0x434   :  { %4816 = vmatprep.subr.bf16.mxu0 %v5207_v1 }
 0x437   :  { %4817 = vmatpush3.bf16.msra.mxu0 %v4881_v61 }
 0x438   :  { %4818 = vmatprep.subr.bf16.mxu0 %v5207_v1 }
 0x43b   :  { %4819 = vmatpush3.bf16.msra.mxu0 %v4882_v63 }
 0x43c   :  { %4820 = vmatprep.subr.bf16.mxu0 %v5207_v1 }
 0x43f   :  { %4821 = vmatpush3.bf16.msra.mxu0 %v4883_v2 }
 0x449   :  { %v5541_v32 = vpop.f32.mrb[28].mxu1 }
 0x44a   :  { %v4768_v34 = vpop.f32.mrb[29].mxu1  ;;  %v1270_v22 = vpack.c.bf16 %v5541_v32, %v5541_v32  ;;  %v4187_v32 = vld [vmem:[%s5707_s4] ss:$0 sm:$0xff] }
 0x44b   :  { %v990_v35 = vpop.f32.mrb[30].mxu1 }
 0x44c   :  { %v4769_v36 = vpop.f32.mrb[31].mxu1 }
 0x45b   :  { %v5543_v37 = vpop.f32.mrb[12].mxu0 }
 0x45c   :  { %v4762_v38 = vpop.f32.mrb[13].mxu0  ;;  %v1269_v20 = vpack.c.bf16 %v5543_v37, %v5543_v37 }
 0x45d   :  { %v944_v39 = vpop.f32.mrb[14].mxu0 }
 0x45e   :  { %v4763_v40 = vpop.f32.mrb[15].mxu0 }
 0x4b4   :  { %v1033_v42 = vpop.f32.mrb[16].mxu0 }
 0x4b5   :  { %v1271_v43 = vpack.c.bf16 %v1033_v42, %v1033_v42  ;;  %v4774_v44 = vpop.f32.mrb[17].mxu0  ;;  %v5052_v42 = vld [vmem:[#allocation2] sm:$0xff] }
 0x4b6   :  { %v1036_v46 = vpop.f32.mrb[18].mxu0  ;;  %v5053_v44 = vld [vmem:[#allocation2 + $0x8] sm:$0xff] }
 0x4b7   :  { %v4775_v47 = vpop.f32.mrb[19].mxu0  ;;  %1279 = vrot.lane.b32.xlu0 %v1271_v43, %s5210_s24  ;;  %v1473_v46 = vld [vmem:[#allocation8] sm:$0xff] }
 0x4b8   :  { %v1477_v47 = vld [vmem:[#allocation8 + $0x40] sm:$0xff] }
 0x4bc   :  { %v1125_v49 = vpop.f32.mrb[20].mxu0 }
 0x4bd   :  { %v1079_v50 = vpop.f32.mrb[32].mxu1  ;;  %v1273_v51 = vpack.c.bf16 %v1125_v49, %v1125_v49  ;;  %v4786_v52 = vpop.f32.mrb[21].mxu0  ;;  %v4199_v49 = vcombine.low %v1473_v46, %v1477_v47 }
 0x4be   :  { %v1272_v54 = vpack.c.bf16 %v1079_v50, %v1079_v50  ;;  %v4780_v55 = vpop.f32.mrb[33].mxu1  ;;  %v1128_v56 = vpop.f32.mrb[22].mxu0  ;;  %v4200_v50 = vcombine.high %v1473_v46, %v1477_v47  ;;  %v1481_v52 = vld [vmem:[#allocation8 + $0x80] sm:$0xff]  ;;  %v1526_v47 = vld [vmem:[#allocation8 + $0x348] sm:$0xff] }
 0x4bf   :  { %v1082_v57 = vpop.f32.mrb[34].mxu1  ;;  %v4787_v58 = vpop.f32.mrb[23].mxu0  ;;  %1285 = vrot.lane.b32.xlu0 %v1273_v51, %s5200_s17  ;;  %v1478_v51 = vld [vmem:[#allocation8 + $0x48] sm:$0xff]  ;;  %v4208_v56 = vcombine.high %v1481_v52, %v1485_v53  ;;  %v4207_v60 = vcombine.low %v1481_v52, %v1485_v53  ;;  %v1533_v52 = vld [vmem:[#allocation8 + $0x3c0] sm:$0xff] }
 0x4c0   :  { %1281 = vrot.lane.b32.xlu1 %v1272_v54, %s5210_s24  ;;  %v4781_v59 = vpop.f32.mrb[35].mxu1  ;;  %v4201_v54 = vcombine.low %v1474_v48, %v1478_v51  ;;  %v4202_v55 = vcombine.high %v1474_v48, %v1478_v51  ;;  %v1482_v57 = vld [vmem:[#allocation8 + $0x88] sm:$0xff]  ;;  %1899 = vmatprep.subr.bf16.mxu1 %v4200_v50  ;;  %v1529_v51 = vld [vmem:[#allocation8 + $0x380] sm:$0xff] }
 0x4c1   :  { %v1486_v58 = vld [vmem:[#allocation8 + $0xc8] sm:$0xff]  ;;  %1900 = vmatpush1.bf16.msra.mxu1 %v4199_v49 }
 0x4c2   :  { %v4210_v59 = vcombine.high %v1482_v57, %v1486_v58  ;;  %1942 = vmatprep.subr.bf16.mxu0 %v4202_v55  ;;  %1901 = vmatprep.subr.bf16.mxu1 %v4208_v56  ;;  %v4209_v61 = vcombine.low %v1482_v57, %v1486_v58  ;;  %v1530_v53 = vld [vmem:[#allocation8 + $0x388] sm:$0xff]  ;;  %v4255_v56 = vcombine.low %v1529_v51, %v1533_v52 }
 0x4c3   :  { %v1534_v55 = vld [vmem:[#allocation8 + $0x3c8] sm:$0xff] }
 0x4c4   :  { %v4257_v57 = vcombine.low %v1530_v53, %v1534_v55  ;;  %v4258_v58 = vcombine.high %v1530_v53, %v1534_v55  ;;  %v1515_v55 = vld [vmem:[#allocation8 + $0x290] sm:$0xff] }
 0x4c5   :  { %1902 = vmatpush1.bf16.msra.mxu1 %v4207_v60  ;;  %v1479_v60 = vld [vmem:[#allocation8 + $0x50] sm:$0xff] }
 0x4f2   :  { %v1171_v3 = vpop.f32.mrb[36].mxu1 }
 0x4f3   :  { %v1274_v4 = vpack.c.bf16 %v1171_v3, %v1171_v3  ;;  %v4792_v5 = vpop.f32.mrb[37].mxu1 }
 0x4f4   :  { %v1174_v11 = vpop.f32.mrb[38].mxu1 }
 0x4f5   :  { %1287 = vrot.lane.b32.xlu1 %v1274_v4, %s5200_s17  ;;  %v4793_v17 = vpop.f32.mrb[39].mxu1  ;;  %v1217_v6 = vpop.f32.mrb[24].mxu0 }
 0x4f6   :  { %v1275_v7 = vpack.c.bf16 %v1217_v6, %v1217_v6  ;;  %v4798_v8 = vpop.f32.mrb[25].mxu0 }
 0x4f7   :  { %v1220_v9 = vpop.f32.mrb[26].mxu0  ;;  %v1493_v8 = vld [vmem:[#allocation8 + $0x140] sm:$0xff] }
 0x4f8   :  { %1291 = vrot.lane.b32.xlu0 %v1275_v7, %s5209_s2  ;;  %v4799_v10 = vpop.f32.mrb[27].mxu0  ;;  %v1489_v7 = vld [vmem:[#allocation8 + $0x100] sm:$0xff]  ;;  %v1490_v9 = vld [vmem:[#allocation8 + $0x108] sm:$0xff] }
 0x4f9   :  { %v4216_v10 = vcombine.high %v1489_v7, %v1493_v8 }
 0x4fa   :  { %v1263_v12 = vpop.f32.mrb[40].mxu1 }
 0x4fb   :  { %v1276_v13 = vpack.c.bf16 %v1263_v12, %v1263_v12  ;;  %v4804_v14 = vpop.f32.mrb[41].mxu1  ;;  %v1494_v12 = vld [vmem:[#allocation8 + $0x148] sm:$0xff]  ;;  %1903 = vmatprep.subr.bf16.mxu1 %v4216_v10 }
 0x4fc   :  { %v1266_v1 = vpop.f32.mrb[42].mxu1  ;;  %v4217_v14 = vcombine.low %v1490_v9, %v1494_v12 }
 0x4fd   :  { %1293 = vrot.lane.b32.xlu1 %v1276_v13, %s5209_s2  ;;  %v4805_v15 = vpop.f32.mrb[43].mxu1  ;;  %v4215_v13 = vcombine.low %v1489_v7, %v1493_v8  ;;  %v4218_v1 = vcombine.high %v1490_v9, %v1494_v12 }
 0x4fe   :  { %v1497_v15 = vld [vmem:[#allocation8 + $0x180] sm:$0xff] }
 0x4ff   :  { %1904 = vmatpush1.bf16.msra.mxu1 %v4215_v13 }
 0x529   :  { %v1280_v16 = vpop.permute.xlu0 %1279 }
 0x52a   :  { %v1297_v24 = vsel %vm434_vm1, %v1269_v20, %v1280_v16  ;;  %v1501_v16 = vld [vmem:[#allocation8 + $0x1c0] sm:$0xff] }
 0x531   :  { %v1286_v19 = vpop.permute.xlu0 %1285 }
 0x532   :  { %v1282_v18 = vpop.permute.xlu1 %1281  ;;  %v1303_v26 = vsel %vm1301_vm4, %v1297_v24, %v1286_v19  ;;  %v4224_v19 = vcombine.high %v1497_v15, %v1501_v16  ;;  %v1505_v24 = vld [vmem:[#allocation8 + $0x200] sm:$0xff] }
 0x533   :  { %v1300_v25 = vsel %vm434_vm1, %v1270_v22, %v1282_v18  ;;  %v1498_v18 = vld [vmem:[#allocation8 + $0x188] sm:$0xff]  ;;  %v4223_v22 = vcombine.low %v1497_v15, %v1501_v16 }
 0x534   :  { %1905 = vmatprep.subr.bf16.mxu1 %v4224_v19  ;;  %v4198_v19 = vld [vmem:[%s5713_s10] ss:$0 sm:$0xff] }
 0x535   :  { %1906 = vmatpush1.bf16.msra.mxu1 %v4223_v22  ;;  %v1483_v22 = vld [vmem:[#allocation8 + $0x90] sm:$0xff] }
 0x567   :  { %v1288_v21 = vpop.permute.xlu1 %1287 }
 0x568   :  { %v1305_v27 = vsel %vm1301_vm4, %v1300_v25, %v1288_v21  ;;  %v1502_v21 = vld [vmem:[#allocation8 + $0x1c8] sm:$0xff]  ;;  %v1509_v25 = vld [vmem:[#allocation8 + $0x240] sm:$0xff] }
 0x569   :  { %v4225_v20 = vcombine.low %v1498_v18, %v1502_v21 }
 0x56a   :  { %v1292_v23 = vpop.permute.xlu0 %1291 }
 0x56b   :  { %v1308_v29 = vsel %vm1306_vm5, %v1303_v26, %v1292_v23  ;;  %v4226_v23 = vcombine.high %v1498_v18, %v1502_v21  ;;  %v1506_v26 = vld [vmem:[#allocation8 + $0x208] sm:$0xff] }
 0x56f   :  { %v1294_v28 = vpop.permute.xlu1 %1293 }
 0x570   :  { %v1310_v34 = vsel %vm1306_vm5, %v1305_v27, %v1294_v28  ;;  %v4232_v27 = vcombine.high %v1505_v24, %v1509_v25  ;;  %v1510_v28 = vld [vmem:[#allocation8 + $0x248] sm:$0xff] }
 0x571   :  { %v4188_v35 = vcombine.low %v1308_v29, %v1310_v34  ;;  %v4231_v29 = vcombine.low %v1505_v24, %v1509_v25  ;;  %v4233_v34 = vcombine.low %v1506_v26, %v1510_v28  ;;  %v1488_v24 = vld [vmem:[#allocation8 + $0xd8] sm:$0xff] }
 0x572   :  { %1907 = vmatprep.subr.bf16.mxu1 %v4232_v27 }
 0x573   :  { %4823 = vmatmul.mubr.bf16.vlgmr.msra.gmra.mrb[28].mxu0 %v4188_v35  ;;  %v4234_v35 = vcombine.high %v1506_v26, %v1510_v28  ;;  %1908 = vmatpush1.bf16.msra.mxu1 %v4231_v29  ;;  %v1495_v29 = vld [vmem:[#allocation8 + $0x150] sm:$0xff] }
 0x574   :  { %1974 = vmatprep.mubr.bf16.mxu0 %v5206_v0  ;;  %1943 = vmatpush1.bf16.msra.mxu0 %v4201_v54  ;;  %v4256_v54 = vcombine.high %v1529_v51, %v1533_v52 }
 0x575   :  { %1944 = vmatprep.subr.bf16.mxu0 %v4210_v59  ;;  %v1475_v59 = vld [vmem:[#allocation8 + $0x10] sm:$0xff] }
 0x578   :  { %1945 = vmatpush1.bf16.msra.mxu0 %v4209_v61  ;;  %v1476_v61 = vld [vmem:[#allocation8 + $0x18] sm:$0xff] }
 0x579   :  { %1946 = vmatprep.subr.bf16.mxu0 %v4218_v1  ;;  %v4197_v1 = vld [vmem:[%s5712_s9] ss:$0 sm:$0xff] }
 0x57c   :  { %1947 = vmatpush1.bf16.msra.mxu0 %v4217_v14 }
 0x57d   :  { %1948 = vmatprep.subr.bf16.mxu0 %v4226_v23  ;;  %v1484_v23 = vld [vmem:[#allocation8 + $0x98] sm:$0xff] }
 0x57e   :  { %v4214_v28 = vcombine.high %v1484_v23, %v1488_v24 }
 0x580   :  { %1949 = vmatpush1.bf16.msra.mxu0 %v4225_v20  ;;  %v1487_v20 = vld [vmem:[#allocation8 + $0xd0] sm:$0xff] }
 0x581   :  { %1950 = vmatprep.subr.bf16.mxu0 %v4234_v35  ;;  %v4212_v27 = vcombine.high %v1483_v22, %v1487_v20  ;;  %v1496_v35 = vld [vmem:[#allocation8 + $0x158] sm:$0xff] }
 0x584   :  { %1951 = vmatpush1.bf16.msra.mxu0 %v4233_v34  ;;  %v1492_v34 = vld [vmem:[#allocation8 + $0x118] sm:$0xff] }
 0x646   :  { %v1422_v36 = vpop.f32.mrb[28].mxu0 }
 0x647   :  { %v1423_v37 = vadd.f32 %v4187_v32, %v1422_v36  ;;  %v4824_v38 = vpop.f32.mrb[29].mxu0  ;;  %v1517_v36 = vld [vmem:[#allocation8 + $0x2c0] sm:$0xff] }
 0x648   :  { %v1425_v39 = vpop.f32.mrb[30].mxu0 }
 0x649   :  { %v1426_v40 = vadd.f32 %v4187_v32, %v1425_v39  ;;  %v4825_v41 = vpop.f32.mrb[31].mxu0  ;;  %v1429_v43 = vadd.f32 %v5052_v42, %v1423_v37  ;;  %v1513_v32 = vld [vmem:[#allocation8 + $0x280] sm:$0xff]  ;;  %v1514_v37 = vld [vmem:[#allocation8 + $0x288] sm:$0xff] }
 0x64a   :  { %v4240_v38 = vcombine.high %v1513_v32, %v1517_v36  ;;  %v1518_v39 = vld [vmem:[#allocation8 + $0x2c8] sm:$0xff] }
 0x64b   :  { %1433 = vadd.xlane.f32.xlu0 %v1429_v43  ;;  %v1430_v45 = vadd.f32 %v5053_v44, %v1426_v40  ;;  %v4239_v40 = vcombine.low %v1513_v32, %v1517_v36  ;;  %v4241_v41 = vcombine.low %v1514_v37, %v1518_v39  ;;  %v4242_v42 = vcombine.high %v1514_v37, %v1518_v39  ;;  %v1525_v44 = vld [vmem:[#allocation8 + $0x340] sm:$0xff]  ;;  %v1499_v39 = vld [vmem:[#allocation8 + $0x190] sm:$0xff] }
 0x64c   :  { %1909 = vmatprep.subr.bf16.mxu1 %v4240_v38  ;;  %v4211_v32 = vcombine.low %v1483_v22, %v1487_v20  ;;  %v4213_v36 = vcombine.low %v1484_v23, %v1488_v24  ;;  %v4222_v38 = vcombine.high %v1492_v34, %v1496_v35  ;;  %v2224_v22 = vld [vmem:[#allocation8 + $0x28] sm:$0xff] }
 0x64d   :  { %1435 = vadd.xlane.f32.xlu1 %v1430_v45  ;;  %1952 = vmatprep.subr.bf16.mxu0 %v4242_v42  ;;  %v1504_v42 = vld [vmem:[#allocation8 + $0x1d8] sm:$0xff]  ;;  %v2228_v20 = vld [vmem:[#allocation8 + $0x68] sm:$0xff] }
 0x64e   :  { %1910 = vmatpush1.bf16.msra.mxu1 %v4239_v40  ;;  %1953 = vmatpush1.bf16.msra.mxu0 %v4241_v41  ;;  %v1503_v40 = vld [vmem:[#allocation8 + $0x1d0] sm:$0xff]  ;;  %v1500_v41 = vld [vmem:[#allocation8 + $0x198] sm:$0xff] }
 0x64f   :  { %v4227_v51 = vcombine.low %v1499_v39, %v1503_v40  ;;  %v4229_v52 = vcombine.low %v1500_v41, %v1504_v42 }
 0x6d8   :  { %v1434_v63 = vpop.xlane.xlu0 %1433 }
 0x6d9   :  { %v1438_v2 = vmul.f32 0.0078125, %v1434_v63  ;;  %v4203_v63 = vcombine.low %v1475_v59, %v1479_v60 }
 0x6da   :  { %v1436_v3 = vpop.xlane.xlu1 %1435 }
 0x6db   :  { %v5568_v4 = vsub.f32 %v1429_v43, %v1438_v2  ;;  %v1439_v5 = vmul.f32 0.0078125, %v1436_v3  ;;  %v1521_v43 = vld [vmem:[#allocation8 + $0x300] sm:$0xff]  ;;  %v4204_v2 = vcombine.high %v1475_v59, %v1479_v60  ;;  %v1480_v3 = vld [vmem:[#allocation8 + $0x58] sm:$0xff] }
 0x6dc   :  { %v4248_v46 = vcombine.high %v1521_v43, %v1525_v44  ;;  %v4247_v48 = vcombine.low %v1521_v43, %v1525_v44  ;;  %v4221_v44 = vcombine.low %v1492_v34, %v1496_v35  ;;  %v2232_v34 = vld [vmem:[#allocation8 + $0xa8] sm:$0xff] }
 0x6dd   :  { %v5570_v11 = vsub.f32 %v1430_v45, %v1439_v5  ;;  %v1442_v17 = vmul.f32 %v5568_v4, %v5568_v4  ;;  %v1522_v45 = vld [vmem:[#allocation8 + $0x308] sm:$0xff]  ;;  %v4205_v5 = vcombine.low %v1476_v61, %v1480_v3 }
 0x6de   :  { %v4249_v49 = vcombine.low %v1522_v45, %v1526_v47  ;;  %v4250_v50 = vcombine.high %v1522_v45, %v1526_v47  ;;  %1911 = vmatprep.subr.bf16.mxu1 %v4248_v46  ;;  %v4228_v45 = vcombine.high %v1499_v39, %v1503_v40  ;;  %v4230_v46 = vcombine.high %v1500_v41, %v1504_v42  ;;  %v1507_v47 = vld [vmem:[#allocation8 + $0x210] sm:$0xff]  ;;  %v2236_v35 = vld [vmem:[#allocation8 + $0xe8] sm:$0xff]  ;;  %v2239_v39 = vld [vmem:[#allocation8 + $0x120] sm:$0xff] }
 0x6df   :  { %1444 = vadd.xlane.f32.xlu0 %v1442_v17  ;;  %v1443_v6 = vmul.f32 %v5570_v11, %v5570_v11  ;;  %1912 = vmatpush1.bf16.msra.mxu1 %v4247_v48  ;;  %v4206_v17 = vcombine.high %v1476_v61, %v1480_v3  ;;  %v1511_v48 = vld [vmem:[#allocation8 + $0x250] sm:$0xff]  ;;  %v2243_v40 = vld [vmem:[#allocation8 + $0x160] sm:$0xff]  ;;  %v2240_v41 = vld [vmem:[#allocation8 + $0x128] sm:$0xff] }
 0x6e0   :  { %1954 = vmatprep.subr.bf16.mxu0 %v4250_v50  ;;  %1913 = vmatprep.subr.bf16.mxu1 %v4256_v54  ;;  %v1512_v50 = vld [vmem:[#allocation8 + $0x258] sm:$0xff]  ;;  %v4236_v53 = vcombine.high %v1507_v47, %v1511_v48  ;;  %v4235_v59 = vcombine.low %v1507_v47, %v1511_v48  ;;  %v1527_v3 = vld [vmem:[#allocation8 + $0x350] sm:$0xff]  ;;  %v2244_v42 = vld [vmem:[#allocation8 + $0x168] sm:$0xff] }
 0x6e1   :  { %1955 = vmatpush1.bf16.msra.mxu0 %v4249_v49  ;;  %v1508_v49 = vld [vmem:[#allocation8 + $0x218] sm:$0xff]  ;;  %v2247_v47 = vld [vmem:[#allocation8 + $0x1a0] sm:$0xff] }
 0x6e2   :  { %1956 = vmatprep.subr.bf16.mxu0 %v4258_v58  ;;  %v4238_v54 = vcombine.high %v1508_v49, %v1512_v50  ;;  %v1520_v58 = vld [vmem:[#allocation8 + $0x2d8] sm:$0xff]  ;;  %v4237_v60 = vcombine.low %v1508_v49, %v1512_v50  ;;  %v2251_v48 = vld [vmem:[#allocation8 + $0x1e0] sm:$0xff]  ;;  %v2248_v49 = vld [vmem:[#allocation8 + $0x1a8] sm:$0xff] }
 0x6e3   :  { %1446 = vadd.xlane.f32.xlu0 %v1443_v6  ;;  %1914 = vmatpush1.bf16.msra.mxu1 %v4255_v56  ;;  %v1519_v56 = vld [vmem:[#allocation8 + $0x2d0] sm:$0xff]  ;;  %v2252_v50 = vld [vmem:[#allocation8 + $0x1e8] sm:$0xff] }
 0x6e4   :  { %1985 = vmatprep.subr.bf16.mxu1 %v4204_v2  ;;  %v4244_v61 = vcombine.high %v1515_v55, %v1519_v56  ;;  %v1523_v2 = vld [vmem:[#allocation8 + $0x310] sm:$0xff] }
 0x6e5   :  { %1957 = vmatpush1.bf16.msra.mxu0 %v4257_v57  ;;  %v1516_v57 = vld [vmem:[#allocation8 + $0x298] sm:$0xff] }
 0x6e6   :  { %2028 = vmatprep.subr.bf16.mxu0 %v4206_v17  ;;  %v1528_v17 = vld [vmem:[#allocation8 + $0x358] sm:$0xff] }
 0x76c   :  { %v1445_v6 = vpop.xlane.xlu0 %1444 }
 0x76d   :  { %v1448_v7 = vmul.f32 0.0078125, %v1445_v6  ;;  %v4243_v6 = vcombine.low %v1515_v55, %v1519_v56  ;;  %v2255_v55 = vld [vmem:[#allocation8 + $0x220] sm:$0xff] }
 0x76e   :  { %v2259_v56 = vld [vmem:[#allocation8 + $0x260] sm:$0xff] }
 0x76f   :  { %v1450_v8 = vadd.f32 1e-05, %v1448_v7  ;;  %v4245_v7 = vcombine.low %v1516_v57, %v1520_v58 }
 0x770   :  { %v1447_v9 = vpop.xlane.xlu0 %1446 }
 0x771   :  { %5044 = vrsqrt.f32 %v1450_v8  ;;  %v1449_v10 = vmul.f32 0.0078125, %v1447_v9  ;;  %v4252_v8 = vcombine.high %v1523_v2, %v1527_v3 }
 0x773   :  { %v1451_v12 = vadd.f32 1e-05, %v1449_v10  ;;  %v1531_v10 = vld [vmem:[#allocation8 + $0x390] sm:$0xff] }
 0x775   :  { %5046 = vrsqrt.f32 %v1451_v12  ;;  %v1535_v12 = vld [vmem:[#allocation8 + $0x3d0] sm:$0xff] }
 0x776   :  { %v4259_v23 = vcombine.low %v1531_v10, %v1535_v12 }
 0x77b   :  { %v5045_v13 = vpop.eup %5044 }
 0x77c   :  { %v1454_v14 = vmul.f32 %v5045_v13, %v5568_v4  ;;  %v1532_v13 = vld [vmem:[#allocation8 + $0x398] sm:$0xff] }
 0x77e   :  { %v1462_v16 = vmul.f32 %v4197_v1, %v1454_v14  ;;  %v1536_v14 = vld [vmem:[#allocation8 + $0x3d8] sm:$0xff] }
 0x77f   :  { %v5047_v15 = vpop.eup %5046  ;;  %v4261_v24 = vcombine.low %v1532_v13, %v1536_v14 }
 0x780   :  { %v1455_v18 = vmul.f32 %v5047_v15, %v5570_v11  ;;  %v5584_v25 = vadd.f32 %v4198_v19, %v1462_v16  ;;  %v1491_v11 = vld [vmem:[#allocation8 + $0x110] sm:$0xff]  ;;  %v4260_v16 = vcombine.high %v1531_v10, %v1535_v12  ;;  %v2271_v10 = vld [vmem:[#allocation8 + $0x320] sm:$0xff] }
 0x781   :  { %v4220_v37 = vcombine.high %v1491_v11, %v1495_v29  ;;  %v4219_v43 = vcombine.low %v1491_v11, %v1495_v29  ;;  %v2231_v11 = vld [vmem:[#allocation8 + $0xa0] sm:$0xff] }
 0x782   :  { %v1463_v21 = vmul.f32 %v4197_v1, %v1455_v18  ;;  %v4251_v1 = vcombine.low %v1523_v2, %v1527_v3  ;;  %v4262_v18 = vcombine.high %v1532_v13, %v1536_v14  ;;  %v2235_v29 = vld [vmem:[#allocation8 + $0xe0] sm:$0xff]  ;;  %v2272_v13 = vld [vmem:[#allocation8 + $0x328] sm:$0xff] }
 0x783   :  { %v2263_v2 = vld [vmem:[#allocation8 + $0x2a0] sm:$0xff]  ;;  %v2276_v14 = vld [vmem:[#allocation8 + $0x368] sm:$0xff] }
 0x784   :  { %v5586_v4 = vadd.f32 %v4198_v19, %v1463_v21  ;;  %v2223_v19 = vld [vmem:[#allocation8 + $0x20] sm:$0xff] }
 0x785   :  { %v2227_v21 = vld [vmem:[#allocation8 + $0x60] sm:$0xff] }
 0x786   :  { %v5590_v26 = vpack.c.bf16 %v5586_v4, %v5584_v25  ;;  %v2267_v3 = vld [vmem:[#allocation8 + $0x2e0] sm:$0xff] }
 0x787   :  { %v2275_v12 = vld [vmem:[#allocation8 + $0x360] sm:$0xff] }
 0x788   :  { %1932 = vmatmul.mubr.bf16.vlgmr.msra.gmra.mrb[44].mxu1 %v5590_v26  ;;  %1975 = vmatmul.mubr.bf16.vlgmr.msra.gmra.mrb[32].mxu0 %v5590_v26 }
 0x789   :  { %1986 = vmatpush1.bf16.msra.mxu1 %v4203_v63  ;;  %2029 = vmatpush1.bf16.msra.mxu0 %v4205_v5  ;;  %v4246_v63 = vcombine.high %v1516_v57, %v1520_v58  ;;  %v1524_v5 = vld [vmem:[#allocation8 + $0x318] sm:$0xff]  ;;  %v2256_v57 = vld [vmem:[#allocation8 + $0x228] sm:$0xff] }
 0x78a   :  { %1987 = vmatprep.subr.bf16.mxu1 %v4212_v27  ;;  %2030 = vmatprep.subr.bf16.mxu0 %v4214_v28  ;;  %v4254_v9 = vcombine.high %v1524_v5, %v1528_v17  ;;  %v4253_v15 = vcombine.low %v1524_v5, %v1528_v17  ;;  %v4264_v27 = vcombine.high %v2223_v19, %v2227_v21  ;;  %v2260_v58 = vld [vmem:[#allocation8 + $0x268] sm:$0xff] }
 0x78b   :  { %2017 = vmatprep.mubr.bf16.mxu1 %v5206_v0  ;;  %2060 = vmatprep.mubr.bf16.mxu0 %v5206_v0  ;;  %v4266_v28 = vcombine.high %v2224_v22, %v2228_v20  ;;  %v2264_v5 = vld [vmem:[#allocation8 + $0x2a8] sm:$0xff] }
 0x78c   :  { %v2268_v17 = vld [vmem:[#allocation8 + $0x2e8] sm:$0xff] }
 0x78d   :  { %1988 = vmatpush1.bf16.msra.mxu1 %v4211_v32  ;;  %2031 = vmatpush1.bf16.msra.mxu0 %v4213_v36  ;;  %v4263_v32 = vcombine.low %v2223_v19, %v2227_v21  ;;  %v4265_v36 = vcombine.low %v2224_v22, %v2228_v20  ;;  %v2279_v19 = vld [vmem:[#allocation8 + $0x3a0] sm:$0xff]  ;;  %v2280_v22 = vld [vmem:[#allocation8 + $0x3a8] sm:$0xff] }
 0x78e   :  { %1989 = vmatprep.subr.bf16.mxu1 %v4220_v37  ;;  %2032 = vmatprep.subr.bf16.mxu0 %v4222_v38  ;;  %v4272_v37 = vcombine.high %v2231_v11, %v2235_v29  ;;  %v4274_v38 = vcombine.high %v2232_v34, %v2236_v35  ;;  %v2283_v21 = vld [vmem:[#allocation8 + $0x3e0] sm:$0xff]  ;;  %v2284_v20 = vld [vmem:[#allocation8 + $0x3e8] sm:$0xff] }
 0x791   :  { %1990 = vmatpush1.bf16.msra.mxu1 %v4219_v43  ;;  %2033 = vmatpush1.bf16.msra.mxu0 %v4221_v44  ;;  %v4271_v43 = vcombine.low %v2231_v11, %v2235_v29  ;;  %v4273_v44 = vcombine.low %v2232_v34, %v2236_v35  ;;  %v2225_v11 = vld [vmem:[#allocation8 + $0x30] sm:$0xff]  ;;  %v2226_v34 = vld [vmem:[#allocation8 + $0x38] sm:$0xff] }
 0x792   :  { %1991 = vmatprep.subr.bf16.mxu1 %v4228_v45  ;;  %2034 = vmatprep.subr.bf16.mxu0 %v4230_v46  ;;  %v4280_v45 = vcombine.high %v2239_v39, %v2243_v40  ;;  %v4282_v46 = vcombine.high %v2240_v41, %v2244_v42  ;;  %v2229_v29 = vld [vmem:[#allocation8 + $0x70] sm:$0xff]  ;;  %v2230_v35 = vld [vmem:[#allocation8 + $0x78] sm:$0xff] }
 0x795   :  { %1992 = vmatpush1.bf16.msra.mxu1 %v4227_v51  ;;  %2035 = vmatpush1.bf16.msra.mxu0 %v4229_v52  ;;  %v4279_v51 = vcombine.low %v2239_v39, %v2243_v40  ;;  %v4281_v52 = vcombine.low %v2240_v41, %v2244_v42  ;;  %v2233_v39 = vld [vmem:[#allocation8 + $0xb0] sm:$0xff]  ;;  %v2234_v41 = vld [vmem:[#allocation8 + $0xb8] sm:$0xff] }
 0x796   :  { %1993 = vmatprep.subr.bf16.mxu1 %v4236_v53  ;;  %2036 = vmatprep.subr.bf16.mxu0 %v4238_v54  ;;  %v4288_v53 = vcombine.high %v2247_v47, %v2251_v48  ;;  %v4290_v54 = vcombine.high %v2248_v49, %v2252_v50  ;;  %v2237_v40 = vld [vmem:[#allocation8 + $0xf0] sm:$0xff]  ;;  %v2238_v42 = vld [vmem:[#allocation8 + $0xf8] sm:$0xff] }
 0x799   :  { %1994 = vmatpush1.bf16.msra.mxu1 %v4235_v59  ;;  %2037 = vmatpush1.bf16.msra.mxu0 %v4237_v60  ;;  %v4287_v59 = vcombine.low %v2247_v47, %v2251_v48  ;;  %v4289_v60 = vcombine.low %v2248_v49, %v2252_v50  ;;  %v2241_v47 = vld [vmem:[#allocation8 + $0x130] sm:$0xff]  ;;  %v2242_v49 = vld [vmem:[#allocation8 + $0x138] sm:$0xff] }
 0x79a   :  { %1995 = vmatprep.subr.bf16.mxu1 %v4244_v61  ;;  %2038 = vmatprep.subr.bf16.mxu0 %v4246_v63  ;;  %v4296_v61 = vcombine.high %v2255_v55, %v2259_v56  ;;  %v4298_v63 = vcombine.high %v2256_v57, %v2260_v58  ;;  %v2245_v48 = vld [vmem:[#allocation8 + $0x170] sm:$0xff]  ;;  %v2246_v50 = vld [vmem:[#allocation8 + $0x178] sm:$0xff] }
 0x79d   :  { %1996 = vmatpush1.bf16.msra.mxu1 %v4243_v6  ;;  %2039 = vmatpush1.bf16.msra.mxu0 %v4245_v7  ;;  %v4295_v6 = vcombine.low %v2255_v55, %v2259_v56  ;;  %v4297_v7 = vcombine.low %v2256_v57, %v2260_v58  ;;  %v2249_v55 = vld [vmem:[#allocation8 + $0x1b0] sm:$0xff]  ;;  %v2250_v57 = vld [vmem:[#allocation8 + $0x1b8] sm:$0xff] }
 0x79e   :  { %1997 = vmatprep.subr.bf16.mxu1 %v4252_v8  ;;  %2040 = vmatprep.subr.bf16.mxu0 %v4254_v9  ;;  %v4304_v8 = vcombine.high %v2263_v2, %v2267_v3  ;;  %v4306_v9 = vcombine.high %v2264_v5, %v2268_v17  ;;  %v2253_v56 = vld [vmem:[#allocation8 + $0x1f0] sm:$0xff]  ;;  %v2254_v58 = vld [vmem:[#allocation8 + $0x1f8] sm:$0xff] }
 0x7a1   :  { %1998 = vmatpush1.bf16.msra.mxu1 %v4251_v1  ;;  %2041 = vmatpush1.bf16.msra.mxu0 %v4253_v15  ;;  %v4303_v1 = vcombine.low %v2263_v2, %v2267_v3  ;;  %v4305_v15 = vcombine.low %v2264_v5, %v2268_v17  ;;  %v2257_v2 = vld [vmem:[#allocation8 + $0x230] sm:$0xff]  ;;  %v2258_v5 = vld [vmem:[#allocation8 + $0x238] sm:$0xff] }
 0x7a2   :  { %1999 = vmatprep.subr.bf16.mxu1 %v4260_v16  ;;  %2042 = vmatprep.subr.bf16.mxu0 %v4262_v18  ;;  %v4312_v16 = vcombine.high %v2271_v10, %v2275_v12  ;;  %v4314_v18 = vcombine.high %v2272_v13, %v2276_v14  ;;  %v2261_v3 = vld [vmem:[#allocation8 + $0x270] sm:$0xff]  ;;  %v2262_v17 = vld [vmem:[#allocation8 + $0x278] sm:$0xff] }
 0x7a5   :  { %2000 = vmatpush1.bf16.msra.mxu1 %v4259_v23  ;;  %2043 = vmatpush1.bf16.msra.mxu0 %v4261_v24  ;;  %v4311_v23 = vcombine.low %v2271_v10, %v2275_v12  ;;  %v4313_v24 = vcombine.low %v2272_v13, %v2276_v14  ;;  %v2269_v10 = vld [vmem:[#allocation8 + $0x2f0] sm:$0xff]  ;;  %v2266_v12 = vld [vmem:[#allocation8 + $0x2b8] sm:$0xff]  ;;  %v4299_v14 = vcombine.low %v2257_v2, %v2261_v3 }
 0x7a6   :  { %2649 = vmatprep.subr.bf16.mxu1 %v4264_v27  ;;  %2692 = vmatprep.subr.bf16.mxu0 %v4266_v28  ;;  %v4320_v27 = vcombine.high %v2279_v19, %v2283_v21  ;;  %v4322_v28 = vcombine.high %v2280_v22, %v2284_v20  ;;  %v2270_v13 = vld [vmem:[#allocation8 + $0x2f8] sm:$0xff] }
 0x7a8   :  { %2018 = vmatmul.mubr.bf16.vlgmr.msra.gmra.mrb[48].mxu1 %v5590_v26  ;;  %2061 = vmatmul.mubr.bf16.vlgmr.msra.gmra.mrb[36].mxu0 %v5590_v26 }
 0x7a9   :  { %2650 = vmatpush1.bf16.msra.mxu1 %v4263_v32  ;;  %2693 = vmatpush1.bf16.msra.mxu0 %v4265_v36  ;;  %v4319_v32 = vcombine.low %v2279_v19, %v2283_v21  ;;  %v4321_v36 = vcombine.low %v2280_v22, %v2284_v20  ;;  %v2277_v19 = vld [vmem:[#allocation8 + $0x370] sm:$0xff]  ;;  %v2274_v21 = vld [vmem:[#allocation8 + $0x338] sm:$0xff] }
 0x7aa   :  { %2651 = vmatprep.subr.bf16.mxu1 %v4272_v37  ;;  %2694 = vmatprep.subr.bf16.mxu0 %v4274_v38  ;;  %v4268_v37 = vcombine.high %v2225_v11, %v2229_v29  ;;  %v4270_v38 = vcombine.high %v2226_v34, %v2230_v35  ;;  %v2278_v22 = vld [vmem:[#allocation8 + $0x378] sm:$0xff] }
 0x7ab   :  { %2681 = vmatprep.mubr.bf16.mxu1 %v5206_v0  ;;  %2724 = vmatprep.mubr.bf16.mxu0 %v5206_v0 }
 0x7ad   :  { %2652 = vmatpush1.bf16.msra.mxu1 %v4271_v43  ;;  %2695 = vmatpush1.bf16.msra.mxu0 %v4273_v44  ;;  %v4267_v43 = vcombine.low %v2225_v11, %v2229_v29  ;;  %v4269_v44 = vcombine.low %v2226_v34, %v2230_v35  ;;  %v2285_v11 = vld [vmem:[#allocation8 + $0x3f0] sm:$0xff]  ;;  %v2282_v29 = vld [vmem:[#allocation8 + $0x3b8] sm:$0xff] }
 0x7ae   :  { %2653 = vmatprep.subr.bf16.mxu1 %v4280_v45  ;;  %2696 = vmatprep.subr.bf16.mxu0 %v4282_v46  ;;  %v4276_v45 = vcombine.high %v2233_v39, %v2237_v40  ;;  %v4278_v46 = vcombine.high %v2234_v41, %v2238_v42  ;;  %v2286_v34 = vld [vmem:[#allocation8 + $0x3f8] sm:$0xff] }
 0x7b1   :  { %2654 = vmatpush1.bf16.msra.mxu1 %v4279_v51  ;;  %2697 = vmatpush1.bf16.msra.mxu0 %v4281_v52  ;;  %v4275_v51 = vcombine.low %v2233_v39, %v2237_v40  ;;  %v4277_v52 = vcombine.low %v2234_v41, %v2238_v42  ;;  %v4325_v39 = vcombine.low %v2282_v29, %v2286_v34  ;;  %v4884_v40 = vld [vmem:[#allocation10 + $0x240] sm:$0xff]  }
 0x7b2   :  { %2655 = vmatprep.subr.bf16.mxu1 %v4288_v53  ;;  %2698 = vmatprep.subr.bf16.mxu0 %v4290_v54  ;;  %v4284_v53 = vcombine.high %v2241_v47, %v2245_v48  ;;  %v4286_v54 = vcombine.high %v2242_v49, %v2246_v50  ;;  %v4885_v41 = vld [vmem:[#allocation10 + $0x2c0] sm:$0xff]  }
 0x7b3   :  { %v4886_v42 = vld [vmem:[#allocation10 + $0x200] sm:$0xff]  }
 0x7b5   :  { %2656 = vmatpush1.bf16.msra.mxu1 %v4287_v59  ;;  %2699 = vmatpush1.bf16.msra.mxu0 %v4289_v60  ;;  %v4283_v59 = vcombine.low %v2241_v47, %v2245_v48  ;;  %v4285_v60 = vcombine.low %v2242_v49, %v2246_v50  ;;  %v4891_v47 = vld [vmem:[#allocation10 + $0x288] sm:$0xff]   ;;  %v4892_v48 = vld [vmem:[#allocation10 + $0x250] sm:$0xff]  }
 0x7b6   :  { %2657 = vmatprep.subr.bf16.mxu1 %v4296_v61  ;;  %2700 = vmatprep.subr.bf16.mxu0 %v4298_v63  ;;  %v4292_v61 = vcombine.high %v2249_v55, %v2253_v56  ;;  %v4294_v63 = vcombine.high %v2250_v57, %v2254_v58  ;;  %v4893_v49 = vld [vmem:[#allocation10 + $0x2d0] sm:$0xff]  }
 0x7b7   :  { %v4894_v50 = vld [vmem:[#allocation10 + $0x210] sm:$0xff]  }
 0x7b9   :  { %2658 = vmatpush1.bf16.msra.mxu1 %v4295_v6  ;;  %2701 = vmatpush1.bf16.msra.mxu0 %v4297_v7  ;;  %v4291_v6 = vcombine.low %v2249_v55, %v2253_v56  ;;  %v4293_v7 = vcombine.low %v2250_v57, %v2254_v58  ;;  %v4900_v55 = vld [vmem:[#allocation10 + $0x260] sm:$0xff]  }
 0x7ba   :  { %2659 = vmatprep.subr.bf16.mxu1 %v4304_v8  ;;  %2702 = vmatprep.subr.bf16.mxu0 %v4306_v9  ;;  %v4300_v8 = vcombine.high %v2257_v2, %v2261_v3  ;;  %v2265_v9 = vld [vmem:[#allocation8 + $0x2b0] sm:$0xff]  ;;  %v4901_v56 = vld [vmem:[#allocation10 + $0x2e0] sm:$0xff]  }
 0x7bb   :  { %v4307_v20 = vcombine.low %v2265_v9, %v2269_v10  ;;  %v4902_v57 = vld [vmem:[#allocation10 + $0x220] sm:$0xff]   ;;  %v4908_v2 = vld [vmem:[#allocation10 + $0x270] sm:$0xff]  }
 0x7bc   :  { %v4903_v58 = vld [vmem:[#allocation10 + $0x2a0] sm:$0xff]   ;;  %v4909_v3 = vld [vmem:[#allocation10 + $0x2f0] sm:$0xff]  }
 0x7bd   :  { %2660 = vmatpush1.bf16.msra.mxu1 %v4303_v1  ;;  %2703 = vmatpush1.bf16.msra.mxu0 %v4305_v15  ;;  %v4301_v1 = vcombine.low %v2258_v5, %v2262_v17  ;;  %v4308_v15 = vcombine.high %v2265_v9, %v2269_v10  ;;  %v4916_v9 = vld [vmem:[#allocation10 + $0x340] sm:$0xff]  }
 0x7be   :  { %2661 = vmatprep.subr.bf16.mxu1 %v4312_v16  ;;  %2704 = vmatprep.subr.bf16.mxu0 %v4314_v18  ;;  %v4310_v16 = vcombine.high %v2266_v12, %v2270_v13  ;;  %v2273_v18 = vld [vmem:[#allocation8 + $0x330] sm:$0xff]  ;;  %v4917_v10 = vld [vmem:[#allocation10 + $0x3c0] sm:$0xff]  }
 0x7bf   :  { %v4315_v35 = vcombine.low %v2273_v18, %v2277_v19 }
 0x7c1   :  { %2662 = vmatpush1.bf16.msra.mxu1 %v4311_v23  ;;  %2705 = vmatpush1.bf16.msra.mxu0 %v4313_v24  ;;  %v4309_v23 = vcombine.low %v2266_v12, %v2270_v13  ;;  %v4316_v24 = vcombine.high %v2273_v18, %v2277_v19  ;;  %v1537_v12 = vld [vmem:[%s5709_s6] sm:$0xff]  ;;  %v1553_v13 = vsub.s32 3, %v5367_v30 }
 0x7c2   :  { %2663 = vmatprep.subr.bf16.mxu1 %v4320_v27  ;;  %2706 = vmatprep.subr.bf16.mxu0 %v4322_v28  ;;  %v4318_v27 = vcombine.high %v2274_v21, %v2278_v22  ;;  %v2281_v28 = vld [vmem:[#allocation8 + $0x3b0] sm:$0xff] }
 0x7c5   :  { %2664 = vmatpush1.bf16.msra.mxu1 %v4319_v32  ;;  %2707 = vmatpush1.bf16.msra.mxu0 %v4321_v36  ;;  %v4317_v32 = vcombine.low %v2274_v21, %v2278_v22  ;;  %v4324_v36 = vcombine.high %v2281_v28, %v2285_v11 }
 0x7c6   :  { %2735 = vmatprep.subr.bf16.mxu1 %v4268_v37  ;;  %2778 = vmatprep.subr.bf16.mxu0 %v4270_v38  ;;  %v4326_v37 = vcombine.high %v2282_v29, %v2286_v34  ;;  %v4323_v38 = vcombine.low %v2281_v28, %v2285_v11 }
 0x7c8   :  { %2682 = vmatmul.mubr.bf16.vlgmr.msra.gmra.mrb[52].mxu1 %v5590_v26  ;;  %2725 = vmatmul.mubr.bf16.vlgmr.msra.gmra.mrb[40].mxu0 %v5590_v26 }
 0x7c9   :  { %2736 = vmatpush1.bf16.msra.mxu1 %v4267_v43  ;;  %2779 = vmatpush1.bf16.msra.mxu0 %v4269_v44  ;;  %v4887_v43 = vld [vmem:[#allocation10 + $0x280] sm:$0xff]   ;;  %v4888_v44 = vld [vmem:[#allocation10 + $0x248] sm:$0xff]  }
 0x7ca   :  { %2737 = vmatprep.subr.bf16.mxu1 %v4276_v45  ;;  %2780 = vmatprep.subr.bf16.mxu0 %v4278_v46  ;;  %v4889_v45 = vld [vmem:[#allocation10 + $0x2c8] sm:$0xff]  }
 0x7cb   :  { %2767 = vmatprep.mubr.bf16.mxu1 %v5206_v0  ;;  %2810 = vmatprep.mubr.bf16.mxu0 %v5206_v0  ;;  %v4302_v0 = vcombine.high %v2258_v5, %v2262_v17  ;;  %v4890_v46 = vld [vmem:[#allocation10 + $0x208] sm:$0xff]   ;;  %v4910_v5 = vld [vmem:[#allocation10 + $0x230] sm:$0xff]  }
 0x7cc   :  { %v4911_v17 = vld [vmem:[#allocation10 + $0x2b0] sm:$0xff]  }
 0x7cd   :  { %2738 = vmatpush1.bf16.msra.mxu1 %v4275_v51  ;;  %2781 = vmatpush1.bf16.msra.mxu0 %v4277_v52  ;;  %v4896_v51 = vld [vmem:[#allocation10 + $0x258] sm:$0xff]  }
 0x7ce   :  { %2739 = vmatprep.subr.bf16.mxu1 %v4284_v53  ;;  %2782 = vmatprep.subr.bf16.mxu0 %v4286_v54  ;;  %v4897_v52 = vld [vmem:[#allocation10 + $0x2d8] sm:$0xff]  }
 0x7cf   :  { %v4898_v53 = vld [vmem:[#allocation10 + $0x218] sm:$0xff]  }
 0x7d0   :  { %v4899_v54 = vld [vmem:[#allocation10 + $0x298] sm:$0xff]  }
 0x7d1   :  { %2740 = vmatpush1.bf16.msra.mxu1 %v4283_v59  ;;  %2783 = vmatpush1.bf16.msra.mxu0 %v4285_v60  ;;  %v4904_v59 = vld [vmem:[#allocation10 + $0x268] sm:$0xff]  }
 0x7d2   :  { %2741 = vmatprep.subr.bf16.mxu1 %v4292_v61  ;;  %2784 = vmatprep.subr.bf16.mxu0 %v4294_v63  ;;  %v4905_v60 = vld [vmem:[#allocation10 + $0x2e8] sm:$0xff]  }
 0x7d3   :  { %v4906_v61 = vld [vmem:[#allocation10 + $0x228] sm:$0xff]  }
 0x7d4   :  { %v4907_v63 = vld [vmem:[#allocation10 + $0x2a8] sm:$0xff]  }
 0x7d5   :  { %2742 = vmatpush1.bf16.msra.mxu1 %v4291_v6  ;;  %2785 = vmatpush1.bf16.msra.mxu0 %v4293_v7  ;;  %v4912_v6 = vld [vmem:[#allocation10 + $0x278] sm:$0xff]  }
 0x7d6   :  { %2743 = vmatprep.subr.bf16.mxu1 %v4300_v8  ;;  %2786 = vmatprep.subr.bf16.mxu0 %v4302_v0  ;;  %v4913_v7 = vld [vmem:[#allocation10 + $0x2f8] sm:$0xff]  }
 0x7d7   :  { %v4914_v8 = vld [vmem:[#allocation10 + $0x238] sm:$0xff]  }
 0x7d8   :  { %v4915_v0 = vld [vmem:[#allocation10 + $0x2b8] sm:$0xff]  }
 0x7d9   :  { %2744 = vmatpush1.bf16.msra.mxu1 %v4299_v14  ;;  %2787 = vmatpush1.bf16.msra.mxu0 %v4301_v1  ;;  %v1542_v14 = vrot.slane %v1537_v12, %v5370_v31  ;;  %v1550_v1 = vrot.slane %v1537_v12, %v5409_v62 }
 0x7da   :  { %2745 = vmatprep.subr.bf16.mxu1 %v4308_v15  ;;  %2788 = vmatprep.subr.bf16.mxu0 %v4310_v16  ;;  %v1546_v15 = vrot.slane %v1537_v12, %v5378_v33  ;;  %v1554_v16 = vrot.slane %v1537_v12, %v1553_v13 }
 0x7dd   :  { %2746 = vmatpush1.bf16.msra.mxu1 %v4307_v20  ;;  %2789 = vmatpush1.bf16.msra.mxu0 %v4309_v23 }
 0x7de   :  { %2747 = vmatprep.subr.bf16.mxu1 %v4316_v24  ;;  %2790 = vmatprep.subr.bf16.mxu0 %v4318_v27 }
 0x7e1   :  { %2748 = vmatpush1.bf16.msra.mxu1 %v4315_v35  ;;  %2791 = vmatpush1.bf16.msra.mxu0 %v4317_v32 }
 0x7e2   :  { %2749 = vmatprep.subr.bf16.mxu1 %v4324_v36  ;;  %2792 = vmatprep.subr.bf16.mxu0 %v4326_v37 }
 0x7e5   :  { %2750 = vmatpush1.bf16.msra.mxu1 %v4323_v38  ;;  %2793 = vmatpush1.bf16.msra.mxu0 %v4325_v39 }
 0x7e6   :  { %4514 = vmatprep.subr.bf16.mxu1 %v4884_v40  ;;  %4536 = vmatprep.subr.bf16.mxu0 %v4885_v41 }
 0x7e8   :  { %2768 = vmatmul.mubr.bf16.vlgmr.msra.gmra.mrb[56].mxu1 %v5590_v26  ;;  %2811 = vmatmul.mubr.bf16.vlgmr.msra.gmra.mrb[44].mxu0 %v5590_v26  ;;  %v4895_v26 = vld [vmem:[#allocation10 + $0x290] sm:$0xff]  }
 0x7e9   :  { %4515 = vmatpush3.bf16.msra.mxu1 %v4886_v42  ;;  %4537 = vmatpush3.bf16.msra.mxu0 %v4887_v43 }
 0x7ea   :  { %4516 = vmatprep.subr.bf16.mxu1 %v4888_v44  ;;  %4538 = vmatprep.subr.bf16.mxu0 %v4889_v45 }
 0x7ed   :  { %4517 = vmatpush3.bf16.msra.mxu1 %v4890_v46  ;;  %4539 = vmatpush3.bf16.msra.mxu0 %v4891_v47 }
 0x7ee   :  { %4518 = vmatprep.subr.bf16.mxu1 %v4892_v48  ;;  %4540 = vmatprep.subr.bf16.mxu0 %v4893_v49 }
 0x7f1   :  { %4519 = vmatpush3.bf16.msra.mxu1 %v4894_v50  ;;  %4541 = vmatpush3.bf16.msra.mxu0 %v4895_v26  ;;  %v1557_v50 = vsub.s32 4, %v5367_v30  ;;  %v1565_v26 = vsub.s32 6, %v5367_v30 }
 0x7f2   :  { %4520 = vmatprep.subr.bf16.mxu1 %v4896_v51  ;;  %4542 = vmatprep.subr.bf16.mxu0 %v4897_v52  ;;  %v1561_v51 = vsub.s32 5, %v5367_v30  ;;  %v1569_v52 = vsub.s32 7, %v5367_v30 }
 0x7f5   :  { %4521 = vmatpush3.bf16.msra.mxu1 %v4898_v53  ;;  %4543 = vmatpush3.bf16.msra.mxu0 %v4899_v54  ;;  %v1558_v53 = vrot.slane %v1537_v12, %v1557_v50  ;;  %v1566_v54 = vrot.slane %v1537_v12, %v1565_v26 }
 0x7f6   :  { %4522 = vmatprep.subr.bf16.mxu1 %v4900_v55  ;;  %4544 = vmatprep.subr.bf16.mxu0 %v4901_v56  ;;  %v1562_v55 = vrot.slane %v1537_v12, %v1561_v51  ;;  %v1570_v56 = vrot.slane %v1537_v12, %v1569_v52 }
 0x7f9   :  { %4523 = vmatpush3.bf16.msra.mxu1 %v4902_v57  ;;  %4545 = vmatpush3.bf16.msra.mxu0 %v4903_v58 }
 0x7fa   :  { %4524 = vmatprep.subr.bf16.mxu1 %v4904_v59  ;;  %4546 = vmatprep.subr.bf16.mxu0 %v4905_v60 }
 0x7fd   :  { %4525 = vmatpush3.bf16.msra.mxu1 %v4906_v61  ;;  %4547 = vmatpush3.bf16.msra.mxu0 %v4907_v63 }
 0x7fe   :  { %4526 = vmatprep.subr.bf16.mxu1 %v4908_v2  ;;  %4548 = vmatprep.subr.bf16.mxu0 %v4909_v3 }
 0x801   :  { %4527 = vmatpush3.bf16.msra.mxu1 %v4910_v5  ;;  %4549 = vmatpush3.bf16.msra.mxu0 %v4911_v17 }
 0x802   :  { %4528 = vmatprep.subr.bf16.mxu1 %v4912_v6  ;;  %4550 = vmatprep.subr.bf16.mxu0 %v4913_v7 }
 0x805   :  { %4529 = vmatpush3.bf16.msra.mxu1 %v4914_v8  ;;  %4551 = vmatpush3.bf16.msra.mxu0 %v4915_v0 }
 0x806   :  { %4558 = vmatprep.subr.bf16.mxu1 %v4916_v9  ;;  %4580 = vmatprep.subr.bf16.mxu0 %v4917_v10 }
 0x85b   :  { %v1933_v18 = vpop.f32.mrb[44].mxu1  ;;  %v1976_v19 = vpop.f32.mrb[32].mxu0 }
 0x85c   :  { %v1934_v21 = vadd.f32 %v1933_v18, %v1542_v14  ;;  %v1977_v22 = vadd.f32 %v1976_v19, %v1550_v1  ;;  %v1935_v20 = vpop.f32.mrb[45].mxu1  ;;  %v1978_v23 = vpop.f32.mrb[33].mxu0 }
 0x85d   :  { %v1936_v24 = vadd.f32 %v1935_v20, %v1546_v15  ;;  %v1979_v27 = vadd.f32 %v1978_v23, %v1554_v16  ;;  %v1937_v28 = vpop.f32.mrb[46].mxu1  ;;  %v1980_v11 = vpop.f32.mrb[34].mxu0 }
 0x85e   :  { %v1938_v29 = vadd.f32 %v1937_v28, %v1542_v14  ;;  %v1981_v34 = vadd.f32 %v1980_v11, %v1550_v1  ;;  %v1939_v35 = vpop.f32.mrb[47].mxu1  ;;  %v1982_v32 = vpop.f32.mrb[35].mxu0  ;;  %v2071_v38 = vmax.f32 %v1934_v21, 0.0  ;;  %v2073_v39 = vmax.f32 %v1977_v22, 0.0 }
 0x85f   :  { %v1940_v36 = vadd.f32 %v1939_v35, %v1546_v15  ;;  %v1983_v37 = vadd.f32 %v1982_v32, %v1554_v16  ;;  %v2072_v42 = vmax.f32 %v1936_v24, 0.0  ;;  %v2074_v43 = vmax.f32 %v1979_v27, 0.0  ;;  %v5646_v27 = vld [vmem:[%s5709_s6 + $0x8] sm:$0xff] }
 0x860   :  { %v2079_v40 = vmax.f32 %v1938_v29, 0.0  ;;  %v2081_v41 = vmax.f32 %v1981_v34, 0.0  ;;  %v2292_v28 = vrot.slane %v5646_v27, %v5370_v31  ;;  %v2300_v11 = vrot.slane %v5646_v27, %v5409_v62 }
 0x861   :  { %v2080_v44 = vmax.f32 %v1940_v36, 0.0  ;;  %v2082_v45 = vmax.f32 %v1983_v37, 0.0  ;;  %v2296_v29 = vrot.slane %v5646_v27, %v5378_v33  ;;  %v2304_v34 = vrot.slane %v5646_v27, %v1553_v13 }
 0x862   :  { %v5615_v46 = vpack.c.bf16 %v2079_v40, %v2071_v38  ;;  %v5617_v47 = vpack.c.bf16 %v2081_v41, %v2073_v39 }
 0x863   :  { %v5619_v48 = vpack.c.bf16 %v2080_v44, %v2072_v42  ;;  %v5621_v49 = vpack.c.bf16 %v2082_v45, %v2074_v43 }
 0x87b   :  { %v2019_v57 = vpop.f32.mrb[48].mxu1  ;;  %v2062_v58 = vpop.f32.mrb[36].mxu0 }
 0x87c   :  { %v2020_v59 = vadd.f32 %v2019_v57, %v1558_v53  ;;  %v2063_v60 = vadd.f32 %v2062_v58, %v1566_v54  ;;  %v2021_v61 = vpop.f32.mrb[49].mxu1  ;;  %v2064_v63 = vpop.f32.mrb[37].mxu0 }
 0x87d   :  { %v2022_v2 = vadd.f32 %v2021_v61, %v1562_v55  ;;  %v2065_v3 = vadd.f32 %v2064_v63, %v1570_v56  ;;  %v2023_v5 = vpop.f32.mrb[50].mxu1  ;;  %v2066_v17 = vpop.f32.mrb[38].mxu0 }
 0x87e   :  { %v2024_v6 = vadd.f32 %v2023_v5, %v1558_v53  ;;  %v2067_v7 = vadd.f32 %v2066_v17, %v1566_v54  ;;  %v2025_v8 = vpop.f32.mrb[51].mxu1  ;;  %v2068_v0 = vpop.f32.mrb[39].mxu0  ;;  %v2075_v14 = vmax.f32 %v2020_v59, 0.0  ;;  %v2077_v1 = vmax.f32 %v2063_v60, 0.0  ;;  %v4918_v5 = vld [vmem:[#allocation10 + $0x300] sm:$0xff]  }
 0x87f   :  { %v2026_v9 = vadd.f32 %v2025_v8, %v1562_v55  ;;  %v2069_v10 = vadd.f32 %v2068_v0, %v1570_v56  ;;  %v2076_v16 = vmax.f32 %v2022_v2, 0.0  ;;  %v2078_v18 = vmax.f32 %v2065_v3, 0.0  ;;  %v4919_v17 = vld [vmem:[#allocation10 + $0x380] sm:$0xff]   ;;  %v4922_v8 = vld [vmem:[#allocation10 + $0x308] sm:$0xff]  }
 0x880   :  { %v2083_v15 = vmax.f32 %v2024_v6, 0.0  ;;  %v2085_v12 = vmax.f32 %v2067_v7, 0.0  ;;  %v4920_v6 = vld [vmem:[#allocation10 + $0x348] sm:$0xff]  }
 0x881   :  { %v2084_v19 = vmax.f32 %v2026_v9, 0.0  ;;  %v2086_v21 = vmax.f32 %v2069_v10, 0.0  ;;  %v4921_v7 = vld [vmem:[#allocation10 + $0x3c8] sm:$0xff]   ;;  %v4924_v9 = vld [vmem:[#allocation10 + $0x350] sm:$0xff]  }
 0x882   :  { %v5635_v22 = vpack.c.bf16 %v2083_v15, %v2075_v14  ;;  %v5637_v20 = vpack.c.bf16 %v2085_v12, %v2077_v1  ;;  %v4923_v0 = vld [vmem:[#allocation10 + $0x388] sm:$0xff]   ;;  %v4925_v10 = vld [vmem:[#allocation10 + $0x3d0] sm:$0xff]   ;;  %v4928_v15 = vld [vmem:[#allocation10 + $0x358] sm:$0xff]  }
 0x883   :  { %v5639_v23 = vpack.c.bf16 %v2084_v19, %v2076_v16  ;;  %v5641_v24 = vpack.c.bf16 %v2086_v21, %v2078_v18  ;;  %v4926_v14 = vld [vmem:[#allocation10 + $0x310] sm:$0xff]   ;;  %v4929_v12 = vld [vmem:[#allocation10 + $0x3d8] sm:$0xff]   ;;  %v4932_v19 = vld [vmem:[#allocation10 + $0x360] sm:$0xff]  }
 0x884   :  { %v4927_v1 = vld [vmem:[#allocation10 + $0x390] sm:$0xff]   ;;  %v4930_v16 = vld [vmem:[#allocation10 + $0x318] sm:$0xff]   ;;  %v4933_v21 = vld [vmem:[#allocation10 + $0x3e0] sm:$0xff]  }
 0x885   :  { %v4931_v18 = vld [vmem:[#allocation10 + $0x398] sm:$0xff]  }
 0x89b   :  { %v2683_v35 = vpop.f32.mrb[52].mxu1  ;;  %v2726_v32 = vpop.f32.mrb[40].mxu0 }
 0x89c   :  { %v2684_v36 = vadd.f32 %v2683_v35, %v2292_v28  ;;  %v2727_v37 = vadd.f32 %v2726_v32, %v2300_v11  ;;  %v2685_v38 = vpop.f32.mrb[53].mxu1  ;;  %v2728_v39 = vpop.f32.mrb[41].mxu0  ;;  %v4938_v35 = vld [vmem:[#allocation10 + $0x328] sm:$0xff]  }
 0x89d   :  { %v2686_v40 = vadd.f32 %v2685_v38, %v2296_v29  ;;  %v2729_v41 = vadd.f32 %v2728_v39, %v2304_v34  ;;  %v2687_v42 = vpop.f32.mrb[54].mxu1  ;;  %v2730_v31 = vpop.f32.mrb[42].mxu0  ;;  %v4939_v32 = vld [vmem:[#allocation10 + $0x3a8] sm:$0xff]   ;;  %v4940_v38 = vld [vmem:[#allocation10 + $0x370] sm:$0xff]  }
 0x89e   :  { %v2688_v43 = vadd.f32 %v2687_v42, %v2292_v28  ;;  %v2731_v44 = vadd.f32 %v2730_v31, %v2300_v11  ;;  %v2689_v62 = vpop.f32.mrb[55].mxu1  ;;  %v2732_v45 = vpop.f32.mrb[43].mxu0  ;;  %v2821_v54 = vmax.f32 %v2684_v36, 0.0  ;;  %v2823_v55 = vmax.f32 %v2727_v37, 0.0  ;;  %v4934_v28 = vld [vmem:[#allocation10 + $0x320] sm:$0xff]   ;;  %v4941_v39 = vld [vmem:[#allocation10 + $0x3f0] sm:$0xff]  }
 0x89f   :  { %v2690_v53 = vadd.f32 %v2689_v62, %v2296_v29  ;;  %v2733_v33 = vadd.f32 %v2732_v45, %v2304_v34  ;;  %v2822_v57 = vmax.f32 %v2686_v40, 0.0  ;;  %v2824_v58 = vmax.f32 %v2729_v41, 0.0  ;;  %v4935_v11 = vld [vmem:[#allocation10 + $0x3a0] sm:$0xff]   ;;  %v4936_v29 = vld [vmem:[#allocation10 + $0x368] sm:$0xff]  }
 0x8a0   :  { %v2829_v56 = vmax.f32 %v2688_v43, 0.0  ;;  %v2831_v13 = vmax.f32 %v2731_v44, 0.0  ;;  %v4937_v34 = vld [vmem:[#allocation10 + $0x3e8] sm:$0xff]   ;;  %v2308_v36 = vrot.slane %v5646_v27, %v1557_v50  ;;  %v2316_v37 = vrot.slane %v5646_v27, %v1565_v26  ;;  %v4942_v43 = vld [vmem:[#allocation10 + $0x330] sm:$0xff]  }
 0x8a1   :  { %v2830_v59 = vmax.f32 %v2690_v53, 0.0  ;;  %v2832_v60 = vmax.f32 %v2733_v33, 0.0  ;;  %v2312_v40 = vrot.slane %v5646_v27, %v1561_v51  ;;  %v2320_v41 = vrot.slane %v5646_v27, %v1569_v52  ;;  %v4943_v50 = vld [vmem:[#allocation10 + $0x3b0] sm:$0xff]   ;;  %v4944_v53 = vld [vmem:[#allocation10 + $0x378] sm:$0xff]  }
 0x8a2   :  { %v2837_v61 = vpack.c.bf16 %v2829_v56, %v2821_v54  ;;  %v2839_v63 = vpack.c.bf16 %v2831_v13, %v2823_v55  ;;  %v4945_v33 = vld [vmem:[#allocation10 + $0x3f8] sm:$0xff]  }
 0x8a3   :  { %v2838_v2 = vpack.c.bf16 %v2830_v59, %v2822_v57  ;;  %v2840_v3 = vpack.c.bf16 %v2832_v60, %v2824_v58  ;;  %v4946_v59 = vld [vmem:[#allocation10 + $0x338] sm:$0xff]  }
 0x8a4   :  { %v4947_v60 = vld [vmem:[#allocation10 + $0x3b8] sm:$0xff]  }
 0x8a5   :  { %3389 = vmatprep.mubr.bf16.mxu1 %v2838_v2  ;;  %3430 = vmatprep.mubr.bf16.mxu0 %v2840_v3 }
 0x8a6   :  { %3390 = vmatmul.mubr.bf16.vlgmr.msra.gmra.mrb[60].mxu1 %v2837_v61  ;;  %3431 = vmatmul.mubr.bf16.vlgmr.msra.gmra.mrb[48].mxu0 %v2839_v63 }
 0x8a7   :  { %4559 = vmatpush3.bf16.msra.mxu1 %v4918_v5  ;;  %4581 = vmatpush3.bf16.msra.mxu0 %v4919_v17  ;;  %v4948_v5 = vld [vmem:[#allocation10 + $0x40] sm:$0xff]  }
 0x8a8   :  { %4560 = vmatprep.subr.bf16.mxu1 %v4920_v6  ;;  %4582 = vmatprep.subr.bf16.mxu0 %v4921_v7  ;;  %v4949_v17 = vld [vmem:[#allocation10 + $0xc0] sm:$0xff]  }
 0x8ab   :  { %4561 = vmatpush3.bf16.msra.mxu1 %v4922_v8  ;;  %4583 = vmatpush3.bf16.msra.mxu0 %v4923_v0 }
 0x8ac   :  { %4562 = vmatprep.subr.bf16.mxu1 %v4924_v9  ;;  %4584 = vmatprep.subr.bf16.mxu0 %v4925_v10 }
 0x8af   :  { %4563 = vmatpush3.bf16.msra.mxu1 %v4926_v14  ;;  %4585 = vmatpush3.bf16.msra.mxu0 %v4927_v1 }
 0x8b0   :  { %4564 = vmatprep.subr.bf16.mxu1 %v4928_v15  ;;  %4586 = vmatprep.subr.bf16.mxu0 %v4929_v12  ;;  %v4950_v15 = vld [vmem:[#allocation10] sm:$0xff]  }
 0x8b1   :  { %v4951_v12 = vld [vmem:[#allocation10 + $0x80] sm:$0xff]  }
 0x8b3   :  { %4565 = vmatpush3.bf16.msra.mxu1 %v4930_v16  ;;  %4587 = vmatpush3.bf16.msra.mxu0 %v4931_v18  ;;  %v4952_v16 = vld [vmem:[#allocation10 + $0x48] sm:$0xff]  }
 0x8b4   :  { %4566 = vmatprep.subr.bf16.mxu1 %v4932_v19  ;;  %4588 = vmatprep.subr.bf16.mxu0 %v4933_v21  ;;  %v4953_v18 = vld [vmem:[#allocation10 + $0xc8] sm:$0xff]  }
 0x8b5   :  { %v4954_v19 = vld [vmem:[#allocation10 + $0x8] sm:$0xff]  }
 0x8b6   :  { %v4955_v21 = vld [vmem:[#allocation10 + $0x88] sm:$0xff]  }
 0x8b7   :  { %4567 = vmatpush3.bf16.msra.mxu1 %v4934_v28  ;;  %4589 = vmatpush3.bf16.msra.mxu0 %v4935_v11  ;;  %v4956_v28 = vld [vmem:[#allocation10 + $0x50] sm:$0xff]  }
 0x8b8   :  { %4568 = vmatprep.subr.bf16.mxu1 %v4936_v29  ;;  %4590 = vmatprep.subr.bf16.mxu0 %v4937_v34  ;;  %v4957_v11 = vld [vmem:[#allocation10 + $0xd0] sm:$0xff]  }
 0x8b9   :  { %v4958_v29 = vld [vmem:[#allocation10 + $0x10] sm:$0xff]  }
 0x8ba   :  { %v4959_v34 = vld [vmem:[#allocation10 + $0x90] sm:$0xff]  }
 0x8bb   :  { %4569 = vmatpush3.bf16.msra.mxu1 %v4938_v35  ;;  %4591 = vmatpush3.bf16.msra.mxu0 %v4939_v32  ;;  %v2769_v42 = vpop.f32.mrb[56].mxu1  ;;  %v2812_v31 = vpop.f32.mrb[44].mxu0  ;;  %v4960_v35 = vld [vmem:[#allocation10 + $0x58] sm:$0xff]  }
 0x8bc   :  { %v2770_v44 = vadd.f32 %v2769_v42, %v2308_v36  ;;  %v2813_v62 = vadd.f32 %v2812_v31, %v2316_v37  ;;  %v2771_v45 = vpop.f32.mrb[57].mxu1  ;;  %v2814_v26 = vpop.f32.mrb[45].mxu0  ;;  %4570 = vmatprep.subr.bf16.mxu1 %v4940_v38  ;;  %4592 = vmatprep.subr.bf16.mxu0 %v4941_v39  ;;  %v4961_v32 = vld [vmem:[#allocation10 + $0xd8] sm:$0xff]   ;;  %v4966_v38 = vld [vmem:[#allocation10 + $0x20] sm:$0xff]   ;;  %v4970_v42 = vld [vmem:[#allocation10 + $0x28] sm:$0xff]  }
 0x8bd   :  { %v2772_v54 = vadd.f32 %v2771_v45, %v2312_v40  ;;  %v2815_v51 = vadd.f32 %v2814_v26, %v2320_v41  ;;  %v2773_v55 = vpop.f32.mrb[58].mxu1  ;;  %v2816_v30 = vpop.f32.mrb[46].mxu0  ;;  %v4967_v39 = vld [vmem:[#allocation10 + $0xa0] sm:$0xff]   ;;  %v4971_v31 = vld [vmem:[#allocation10 + $0xa8] sm:$0xff]   ;;  %v4976_v45 = vld [vmem:[#allocation10 + $0x78] sm:$0xff]  }
 0x8be   :  { %v2774_v56 = vadd.f32 %v2773_v55, %v2308_v36  ;;  %v2817_v52 = vadd.f32 %v2816_v30, %v2316_v37  ;;  %v2775_v27 = vpop.f32.mrb[59].mxu1  ;;  %v2818_v13 = vpop.f32.mrb[47].mxu0  ;;  %v2825_v61 = vmax.f32 %v2770_v44, 0.0  ;;  %v2827_v63 = vmax.f32 %v2813_v62, 0.0  ;;  %v4962_v36 = vld [vmem:[#allocation10 + $0x18] sm:$0xff]   ;;  %v4974_v44 = vld [vmem:[#allocation10 + $0x30] sm:$0xff]  }
 0x8bf   :  { %v2776_v57 = vadd.f32 %v2775_v27, %v2312_v40  ;;  %v2819_v58 = vadd.f32 %v2818_v13, %v2320_v41  ;;  %4571 = vmatpush3.bf16.msra.mxu1 %v4942_v43  ;;  %4593 = vmatpush3.bf16.msra.mxu0 %v4943_v50  ;;  %v2826_v6 = vmax.f32 %v2772_v54, 0.0  ;;  %v2828_v7 = vmax.f32 %v2815_v51, 0.0  ;;  %v4963_v37 = vld [vmem:[#allocation10 + $0x98] sm:$0xff]   ;;  %v4968_v40 = vld [vmem:[#allocation10 + $0x68] sm:$0xff]   ;;  %v4972_v43 = vld [vmem:[#allocation10 + $0x70] sm:$0xff]  }
 0x8c0   :  { %v2833_v2 = vmax.f32 %v2774_v56, 0.0  ;;  %v2835_v3 = vmax.f32 %v2817_v52, 0.0  ;;  %4572 = vmatprep.subr.bf16.mxu1 %v4944_v53  ;;  %4594 = vmatprep.subr.bf16.mxu0 %v4945_v33  ;;  %v4969_v41 = vld [vmem:[#allocation10 + $0xe8] sm:$0xff]   ;;  %v4973_v50 = vld [vmem:[#allocation10 + $0xf0] sm:$0xff]   ;;  %v4977_v26 = vld [vmem:[#allocation10 + $0xf8] sm:$0xff]  }
 0x8c1   :  { %v2834_v8 = vmax.f32 %v2776_v57, 0.0  ;;  %v2836_v0 = vmax.f32 %v2819_v58, 0.0  ;;  %v4975_v62 = vld [vmem:[#allocation10 + $0xb0] sm:$0xff]   ;;  %v4978_v53 = vld [vmem:[#allocation10 + $0x38] sm:$0xff]   ;;  %v4980_v54 = vld [vmem:[#allocation10 + $0x140] sm:$0xff]  }
 0x8c2   :  { %v2841_v9 = vpack.c.bf16 %v2833_v2, %v2825_v61  ;;  %v2843_v10 = vpack.c.bf16 %v2835_v3, %v2827_v63  ;;  %v4979_v33 = vld [vmem:[#allocation10 + $0xb8] sm:$0xff]   ;;  %v4981_v51 = vld [vmem:[#allocation10 + $0x1c0] sm:$0xff]   ;;  %v4984_v56 = vld [vmem:[#allocation10 + $0x148] sm:$0xff]  }
 0x8c3   :  { %v2842_v14 = vpack.c.bf16 %v2834_v8, %v2826_v6  ;;  %v2844_v1 = vpack.c.bf16 %v2836_v0, %v2828_v7  ;;  %4573 = vmatpush3.bf16.msra.mxu1 %v4946_v59  ;;  %4595 = vmatpush3.bf16.msra.mxu0 %v4947_v60  ;;  %v4982_v55 = vld [vmem:[#allocation10 + $0x100] sm:$0xff]   ;;  %v4985_v52 = vld [vmem:[#allocation10 + $0x1c8] sm:$0xff]   ;;  %v4988_v57 = vld [vmem:[#allocation10 + $0x150] sm:$0xff]  }
 0x8c4   :  { %4602 = vmatprep.subr.bf16.mxu1 %v4948_v5  ;;  %4624 = vmatprep.subr.bf16.mxu0 %v4949_v17  ;;  %v4983_v30 = vld [vmem:[#allocation10 + $0x180] sm:$0xff]   ;;  %v4986_v27 = vld [vmem:[#allocation10 + $0x108] sm:$0xff]   ;;  %v4989_v58 = vld [vmem:[#allocation10 + $0x1d0] sm:$0xff]  }
 0x8c5   :  { %3471 = vmatprep.mubr.bf16.mxu1 %v2842_v14  ;;  %3512 = vmatprep.mubr.bf16.mxu0 %v2844_v1  ;;  %v4987_v13 = vld [vmem:[#allocation10 + $0x188] sm:$0xff]   ;;  %v4990_v59 = vld [vmem:[#allocation10 + $0x110] sm:$0xff]   ;;  %v4994_v61 = vld [vmem:[#allocation10 + $0x118] sm:$0xff]  }
 0x8c6   :  { %3472 = vmatmul.mubr.bf16.vlgmr.msra.gmra.mrb[64].mxu1 %v2841_v9  ;;  %3513 = vmatmul.mubr.bf16.vlgmr.msra.gmra.mrb[52].mxu0 %v2843_v10  ;;  %v4991_v60 = vld [vmem:[#allocation10 + $0x190] sm:$0xff]   ;;  %v4996_v63 = vld [vmem:[#allocation10 + $0x160] sm:$0xff]   ;;  %v5000_v5 = vld [vmem:[#allocation10 + $0x168] sm:$0xff]  }
 0x8c7   :  { %4603 = vmatpush3.bf16.msra.mxu1 %v4950_v15  ;;  %4625 = vmatpush3.bf16.msra.mxu0 %v4951_v12  ;;  %v4998_v2 = vld [vmem:[#allocation10 + $0x120] sm:$0xff]   ;;  %v5001_v17 = vld [vmem:[#allocation10 + $0x1e8] sm:$0xff]   ;;  %v5004_v8 = vld [vmem:[#allocation10 + $0x170] sm:$0xff]  }
 0x8c8   :  { %3937 = vmatprep.mubr.bf16.mxu1 %v5619_v48  ;;  %3978 = vmatprep.mubr.bf16.mxu0 %v5621_v49  ;;  %v4964_v48 = vld [vmem:[#allocation10 + $0x60] sm:$0xff]   ;;  %v5002_v6 = vld [vmem:[#allocation10 + $0x128] sm:$0xff]   ;;  %v5005_v0 = vld [vmem:[#allocation10 + $0x1f0] sm:$0xff]  }
 0x8c9   :  { %4604 = vmatprep.subr.bf16.mxu1 %v4952_v16  ;;  %4626 = vmatprep.subr.bf16.mxu0 %v4953_v18  ;;  %v4965_v49 = vld [vmem:[#allocation10 + $0xe0] sm:$0xff]   ;;  %v5003_v7 = vld [vmem:[#allocation10 + $0x1a8] sm:$0xff]   ;;  %v5006_v9 = vld [vmem:[#allocation10 + $0x130] sm:$0xff]  }
 0x8ca   :  { %v4999_v3 = vld [vmem:[#allocation10 + $0x1a0] sm:$0xff]   ;;  %v5007_v10 = vld [vmem:[#allocation10 + $0x1b0] sm:$0xff]   ;;  %v5008_v14 = vld [vmem:[#allocation10 + $0x178] sm:$0xff]  }
 0x8cb   :  { %4605 = vmatpush3.bf16.msra.mxu1 %v4954_v19  ;;  %4627 = vmatpush3.bf16.msra.mxu0 %v4955_v21  ;;  %v5009_v1 = vld [vmem:[#allocation10 + $0x1f8] sm:$0xff]  }
 0x8cc   :  { %4606 = vmatprep.subr.bf16.mxu1 %v4956_v28  ;;  %4628 = vmatprep.subr.bf16.mxu0 %v4957_v11  ;;  %v5010_v15 = vld [vmem:[#allocation10 + $0x138] sm:$0xff]  }
 0x8cd   :  { %v5011_v12 = vld [vmem:[#allocation10 + $0x1b8] sm:$0xff]  }
 0x8cf   :  { %4607 = vmatpush3.bf16.msra.mxu1 %v4958_v29  ;;  %4629 = vmatpush3.bf16.msra.mxu0 %v4959_v34 }
 0x8d0   :  { %4608 = vmatprep.subr.bf16.mxu1 %v4960_v35  ;;  %4630 = vmatprep.subr.bf16.mxu0 %v4961_v32 }
 0x8d3   :  { %4609 = vmatpush3.bf16.msra.mxu1 %v4962_v36  ;;  %4631 = vmatpush3.bf16.msra.mxu0 %v4963_v37 }
 0x8d4   :  { %4610 = vmatprep.subr.bf16.mxu1 %v4964_v48  ;;  %4632 = vmatprep.subr.bf16.mxu0 %v4965_v49 }
 0x8d7   :  { %4611 = vmatpush3.bf16.msra.mxu1 %v4966_v38  ;;  %4633 = vmatpush3.bf16.msra.mxu0 %v4967_v39 }
 0x8d8   :  { %4612 = vmatprep.subr.bf16.mxu1 %v4968_v40  ;;  %4634 = vmatprep.subr.bf16.mxu0 %v4969_v41 }
 0x8db   :  { %4613 = vmatpush3.bf16.msra.mxu1 %v4970_v42  ;;  %4635 = vmatpush3.bf16.msra.mxu0 %v4971_v31 }
 0x8dc   :  { %4614 = vmatprep.subr.bf16.mxu1 %v4972_v43  ;;  %4636 = vmatprep.subr.bf16.mxu0 %v4973_v50 }
 0x8df   :  { %4615 = vmatpush3.bf16.msra.mxu1 %v4974_v44  ;;  %4637 = vmatpush3.bf16.msra.mxu0 %v4975_v62 }
 0x8e0   :  { %4616 = vmatprep.subr.bf16.mxu1 %v4976_v45  ;;  %4638 = vmatprep.subr.bf16.mxu0 %v4977_v26 }
 0x8e3   :  { %4617 = vmatpush3.bf16.msra.mxu1 %v4978_v53  ;;  %4639 = vmatpush3.bf16.msra.mxu0 %v4979_v33 }
 0x8e4   :  { %4646 = vmatprep.subr.bf16.mxu1 %v4980_v54  ;;  %4668 = vmatprep.subr.bf16.mxu0 %v4981_v51 }
 0x8e6   :  { %3938 = vmatmul.mubr.bf16.vlgmr.msra.gmra.mrb[68].mxu1 %v5615_v46  ;;  %3979 = vmatmul.mubr.bf16.vlgmr.msra.gmra.mrb[56].mxu0 %v5617_v47  ;;  %v4992_v46 = vld [vmem:[#allocation10 + $0x158] sm:$0xff]  }
 0x8e7   :  { %4647 = vmatpush3.bf16.msra.mxu1 %v4982_v55  ;;  %4019 = vmatprep.mubr.bf16.mxu1 %v5639_v23  ;;  %v4993_v47 = vld [vmem:[#allocation10 + $0x1d8] sm:$0xff]  }
 0x8e8   :  { %4669 = vmatpush3.bf16.msra.mxu0 %v4983_v30  ;;  %4060 = vmatprep.mubr.bf16.mxu0 %v5641_v24  ;;  %v4995_v23 = vld [vmem:[#allocation10 + $0x198] sm:$0xff]   ;;  %v4997_v24 = vld [vmem:[#allocation10 + $0x1e0] sm:$0xff]  }
 0x8e9   :  { %4648 = vmatprep.subr.bf16.mxu1 %v4984_v56  ;;  %4670 = vmatprep.subr.bf16.mxu0 %v4985_v52 }
 0x8eb   :  { %4649 = vmatpush3.bf16.msra.mxu1 %v4986_v27 }
 0x8ec   :  { %4671 = vmatpush3.bf16.msra.mxu0 %v4987_v13  ;;  %4650 = vmatprep.subr.bf16.mxu1 %v4988_v57 }
 0x8ed   :  { %4672 = vmatprep.subr.bf16.mxu0 %v4989_v58 }
 0x8ef   :  { %4651 = vmatpush3.bf16.msra.mxu1 %v4990_v59 }
 0x8f0   :  { %4673 = vmatpush3.bf16.msra.mxu0 %v4991_v60  ;;  %4652 = vmatprep.subr.bf16.mxu1 %v4992_v46 }
 0x8f1   :  { %4674 = vmatprep.subr.bf16.mxu0 %v4993_v47 }
 0x8f3   :  { %4653 = vmatpush3.bf16.msra.mxu1 %v4994_v61 }
 0x8f4   :  { %4675 = vmatpush3.bf16.msra.mxu0 %v4995_v23  ;;  %4654 = vmatprep.subr.bf16.mxu1 %v4996_v63 }
 0x8f5   :  { %4676 = vmatprep.subr.bf16.mxu0 %v4997_v24 }
 0x8f7   :  { %4655 = vmatpush3.bf16.msra.mxu1 %v4998_v2 }
 0x8f8   :  { %4677 = vmatpush3.bf16.msra.mxu0 %v4999_v3  ;;  %4656 = vmatprep.subr.bf16.mxu1 %v5000_v5 }
 0x8f9   :  { %4678 = vmatprep.subr.bf16.mxu0 %v5001_v17 }
 0x8fb   :  { %4657 = vmatpush3.bf16.msra.mxu1 %v5002_v6 }
 0x8fc   :  { %4679 = vmatpush3.bf16.msra.mxu0 %v5003_v7  ;;  %4658 = vmatprep.subr.bf16.mxu1 %v5004_v8 }
 0x8fd   :  { %4680 = vmatprep.subr.bf16.mxu0 %v5005_v0 }
 0x8ff   :  { %4659 = vmatpush3.bf16.msra.mxu1 %v5006_v9 }
 0x900   :  { %4681 = vmatpush3.bf16.msra.mxu0 %v5007_v10  ;;  %4660 = vmatprep.subr.bf16.mxu1 %v5008_v14 }
 0x901   :  { %4682 = vmatprep.subr.bf16.mxu0 %v5009_v1  ;;  %v4455_v1 = vld [vmem:[%s5711_s8] ss:$0 sm:$0xff] }
 0x903   :  { %4661 = vmatpush3.bf16.msra.mxu1 %v5010_v15 }
 0x904   :  { %4683 = vmatpush3.bf16.msra.mxu0 %v5011_v12 }
 0x906   :  { %4020 = vmatmul.mubr.bf16.vlgmr.msra.gmra.mrb[72].mxu1 %v5635_v22 }
 0x907   :  { %4061 = vmatmul.mubr.bf16.vlgmr.msra.gmra.mrb[60].mxu0 %v5637_v20 }
 0x979   :  { %v4530_v16 = vpop.f32.mrb[60].mxu1  ;;  %v4552_v18 = vpop.f32.mrb[48].mxu0 }
 0x97a   :  { %v4531_v19 = vpop.f32.mrb[61].mxu1  ;;  %v4553_v21 = vpop.f32.mrb[49].mxu0 }
 0x97b   :  { %v4532_v28 = vadd.f32 %v4531_v19, %v4530_v16  ;;  %v4554_v11 = vadd.f32 %v4553_v21, %v4552_v18  ;;  %v4533_v29 = vpop.f32.mrb[62].mxu1  ;;  %v4555_v34 = vpop.f32.mrb[50].mxu0 }
 0x97c   :  { %v4534_v35 = vpop.f32.mrb[63].mxu1  ;;  %v4556_v32 = vpop.f32.mrb[51].mxu0 }
 0x97d   :  { %v3433_v36 = vadd.f32 %v4554_v11, %v4532_v28  ;;  %v4535_v37 = vadd.f32 %v4534_v35, %v4533_v29  ;;  %v4557_v48 = vadd.f32 %v4556_v32, %v4555_v34 }
 0x97f   :  { %v3436_v49 = vadd.f32 %v4557_v48, %v4535_v37 }
 0x999   :  { %v4574_v38 = vpop.f32.mrb[64].mxu1  ;;  %v4596_v39 = vpop.f32.mrb[52].mxu0 }
 0x99a   :  { %v4575_v40 = vpop.f32.mrb[65].mxu1  ;;  %v4597_v22 = vpop.f32.mrb[53].mxu0 }
 0x99b   :  { %v4576_v41 = vadd.f32 %v4575_v40, %v4574_v38  ;;  %v4598_v20 = vadd.f32 %v4597_v22, %v4596_v39  ;;  %v4577_v42 = vpop.f32.mrb[66].mxu1  ;;  %v4599_v31 = vpop.f32.mrb[54].mxu0 }
 0x99c   :  { %v4578_v43 = vpop.f32.mrb[67].mxu1  ;;  %v4600_v50 = vpop.f32.mrb[55].mxu0 }
 0x99d   :  { %v3474_v44 = vadd.f32 %v4576_v41, %v3433_v36  ;;  %v4579_v62 = vadd.f32 %v4578_v43, %v4577_v42  ;;  %v4601_v45 = vadd.f32 %v4600_v50, %v4599_v31  ;;  %v4456_v41 = vld [vmem:[%s5714_s11] ss:$0 sm:$0xff] }
 0x99e   :  { %v4457_v31 = vld [vmem:[%s5715_s12] ss:$0 sm:$0xff] }
 0x99f   :  { %v3515_v26 = vadd.f32 %v4598_v20, %v3474_v44  ;;  %v3477_v53 = vadd.f32 %v4579_v62, %v3436_v49 }
 0x9a1   :  { %v3518_v33 = vadd.f32 %v4601_v45, %v3477_v53 }
 0x9b9   :  { %v4618_v54 = vpop.f32.mrb[68].mxu1  ;;  %v4640_v51 = vpop.f32.mrb[56].mxu0 }
 0x9ba   :  { %v4619_v55 = vpop.f32.mrb[69].mxu1  ;;  %v4641_v30 = vpop.f32.mrb[57].mxu0 }
 0x9bb   :  { %v4620_v56 = vadd.f32 %v4619_v55, %v4618_v54  ;;  %v4642_v52 = vadd.f32 %v4641_v30, %v4640_v51  ;;  %v4621_v27 = vpop.f32.mrb[70].mxu1  ;;  %v4643_v13 = vpop.f32.mrb[58].mxu0 }
 0x9bc   :  { %v4622_v57 = vpop.f32.mrb[71].mxu1  ;;  %v4644_v58 = vpop.f32.mrb[59].mxu0 }
 0x9bd   :  { %v3940_v59 = vadd.f32 %v4620_v56, %v3515_v26  ;;  %v4623_v60 = vadd.f32 %v4622_v57, %v4621_v27  ;;  %v4645_v46 = vadd.f32 %v4644_v58, %v4643_v13 }
 0x9bf   :  { %v3981_v47 = vadd.f32 %v4642_v52, %v3940_v59  ;;  %v3943_v61 = vadd.f32 %v4623_v60, %v3518_v33 }
 0x9c1   :  { %v3984_v23 = vadd.f32 %v4645_v46, %v3943_v61 }
 0x9d9   :  { %v4662_v63 = vpop.f32.mrb[72].mxu1 }
 0x9da   :  { %v4684_v24 = vpop.f32.mrb[60].mxu0  ;;  %v4663_v2 = vpop.f32.mrb[73].mxu1 }
 0x9db   :  { %v4664_v3 = vadd.f32 %v4663_v2, %v4662_v63  ;;  %v4685_v5 = vpop.f32.mrb[61].mxu0  ;;  %v4665_v17 = vpop.f32.mrb[74].mxu1 }
 0x9dc   :  { %v4686_v6 = vadd.f32 %v4685_v5, %v4684_v24  ;;  %v4687_v7 = vpop.f32.mrb[62].mxu0  ;;  %v4666_v8 = vpop.f32.mrb[75].mxu1 }
 0x9dd   :  { %v4022_v0 = vadd.f32 %v4664_v3, %v3981_v47  ;;  %v4667_v9 = vadd.f32 %v4666_v8, %v4665_v17  ;;  %v4688_v10 = vpop.f32.mrb[63].mxu0 }
 0x9de   :  { %v4689_v14 = vadd.f32 %v4688_v10, %v4687_v7 }
 0x9df   :  { %v4063_v15 = vadd.f32 %v4686_v6, %v4022_v0  ;;  %v4025_v12 = vadd.f32 %v4667_v9, %v3984_v23 }
 0x9e1   :  { %v4066_v16 = vadd.f32 %v4689_v14, %v4025_v12  ;;  %v4076_v18 = vadd.f32 %v4455_v1, %v4063_v15 }
 0x9e3   :  { %v4078_v19 = vadd.f32 %v4076_v18, %v5584_v25  ;;  %v4077_v21 = vadd.f32 %v4455_v1, %v4066_v16 }
 0x9e5   :  { %4082 = vadd.xlane.f32.xlu1 %v4078_v19  ;;  %v4079_v28 = vadd.f32 %v4077_v21, %v5586_v4 }
 0x9e7   :  { %4084 = vadd.xlane.f32.xlu0 %v4079_v28 }
 0xa72   :  { %v4083_v11 = vpop.xlane.xlu1 %4082 }
 0xa73   :  { %v4086_v29 = vmul.f32 0.0078125, %v4083_v11 }
 0xa74   :  { %v4085_v34 = vpop.xlane.xlu0 %4084 }
 0xa75   :  { %v4088_v35 = vsub.f32 %v4078_v19, %v4086_v29  ;;  %v4087_v32 = vmul.f32 0.0078125, %v4085_v34 }
 0xa77   :  { %v4089_v36 = vsub.f32 %v4079_v28, %v4087_v32  ;;  %v4090_v37 = vmul.f32 %v4088_v35, %v4088_v35 }
 0xa79   :  { %4092 = vadd.xlane.f32.xlu1 %v4090_v37  ;;  %v4091_v48 = vmul.f32 %v4089_v36, %v4089_v36 }
 0xa7b   :  { %4094 = vadd.xlane.f32.xlu0 %v4091_v48 }
 0xb06   :  { %v4093_v49 = vpop.xlane.xlu1 %4092 }
 0xb07   :  { %v4096_v38 = vmul.f32 0.0078125, %v4093_v49 }
 0xb08   :  { %v4095_v39 = vpop.xlane.xlu0 %4094 }
 0xb09   :  { %v4098_v40 = vadd.f32 1e-05, %v4096_v38  ;;  %v4097_v25 = vmul.f32 0.0078125, %v4095_v39 }
 0xb0b   :  { %5048 = vrsqrt.f32 %v4098_v40  ;;  %v4099_v22 = vadd.f32 1e-05, %v4097_v25 }
 0xb0d   :  { %5050 = vrsqrt.f32 %v4099_v22 }
 0xb15   :  { %v5049_v4 = vpop.eup %5048 }
 0xb16   :  { %v4102_v20 = vmul.f32 %v5049_v4, %v4088_v35 }
 0xb17   :  { %v5051_v42 = vpop.eup %5050 }
 0xb18   :  { %v4103_v43 = vmul.f32 %v5051_v42, %v4089_v36  ;;  %v4110_v50 = vmul.f32 %v4456_v41, %v4102_v20 }
 0xb1a   :  { %v4111_v44 = vmul.f32 %v4456_v41, %v4103_v43  ;;  %v4118_v62 = vadd.f32 %v4457_v31, %v4110_v50 }
 0xb1c   :  { %v4119_v45 = vadd.f32 %v4457_v31, %v4111_v44  ;;  %4120 = vst [vmem:[#allocation11] sm:$0xff] %v4118_v62 }
 0xb1e   :  { %4121 = vst [vmem:[#allocation11 + $0x8] sm:$0xff] %v4119_v45 }
 0xb1f   :  { %5175 = shalt.err (!%p5172_p2)
}
 0xb20   :  { %s5176_s12 = scalar_lea.hbm %s5716_s13, 256 }
 0xb21   :  { %p5177_p3 = scmp.ne.s32.totalorder %s5716_s13, %s5176_s12  ;;  %p5180_p4 = scmp.lt.u32.totalorder %s5176_s12, %s5716_s13 }
 0xb23   :  { %p5182_p5 = pnand %p5180_p4, %p5177_p3 }
 0xb25   :  { %5185 = shalt.err (!%p5182_p5)
}
 0xb26   :  { %4133 = dma.vmem_to_hbm [thread:$0]  %s4128_s19, 256, %s5716_s13, [#allocation4], %s5201_s5, %s5201_s5, %s5202_s23  }
 0xb27   :  { %5192 = dma.done.wait [#allocation4], 256  }
 0xb28   :  { %5193 = vsyncadd [#allocation4], 4294967040 }
 0xb29   :  { %4137 = vsyncpa [#allocation3], 1 }
 0xb2a   :  { %4138 = vsyncpa [#allocation6], 1 }
 0xb2b   :  { %4139 = vsyncpa [#allocation9], 1 }
 0xb2c   :  { %4140 = vsyncpa [#allocation4], 1 }

</bundles_post_ra>
